<compile_context>
chip_gen: v7x
topology: tpu7x:2x2x1
jax: 0.10.0
libtpu: 0.0.40
codegen_flags: <defaults>
</compile_context>

<pallas_src>
import functools

import jax
import jax.numpy as jnp
from jax import lax
from jax.experimental import pallas as pl
from jax.experimental.pallas import tpu as pltpu


_VMEM_LIMIT = 32 * 1024 * 1024   # above v5e's 16 MiB default, safe on v6e/v7x
_LANE = 128
_SUBLANE = 8


def _round_up(x, m):
    return (x + m - 1) // m * m


# ----------------------------------------------------------------------------
# Pallas kernels
# ----------------------------------------------------------------------------
def _mm_bias_kernel(x_ref, w_ref, b_ref, o_ref, *, relu):
    """One (tm, K) x (K, Npad) tile: MXU matmul + bias (+ReLU), f32 epilogue."""
    acc = jnp.dot(x_ref[...], w_ref[...], preferred_element_type=jnp.float32)
    acc = acc + b_ref[...]                     # (1, Npad) broadcasts over rows
    if relu:
        acc = jnp.maximum(acc, 0.0)
    o_ref[...] = acc.astype(o_ref.dtype)


def _fc_fused_kernel(x_ref, w1_ref, b1_ref, w2_ref, b2_ref, o_ref):
    """Fused Linear -> ReLU -> Linear; the hidden activation stays in VMEM."""
    h = jnp.dot(x_ref[...], w1_ref[...], preferred_element_type=jnp.float32)
    h = jnp.maximum(h + b1_ref[...], 0.0)          # f32 epilogue
    h = h.astype(w2_ref.dtype)
    out = jnp.dot(h, w2_ref[...], preferred_element_type=jnp.float32)
    o_ref[...] = (out + b2_ref[...]).astype(o_ref.dtype)


# ----------------------------------------------------------------------------
# Tiled pallas_call wrappers
# ----------------------------------------------------------------------------
def _pad_rows(x, m_pad):
    m = x.shape[0]
    return x if m == m_pad else jnp.pad(x, ((0, m_pad - m), (0, 0)))


def matmul_bias(x, w, b_row, *, relu, out_dtype, tm=512):
    """relu?(x @ w + b).  w is (K, Npad) with Npad % 128 == 0.  -> (M, Npad)."""
    m, k = x.shape
    kw, n_pad = w.shape
    assert k == kw and n_pad % _LANE == 0
    tm = min(tm, _round_up(m, _SUBLANE))
    m_pad = _round_up(m, tm)
    x = _pad_rows(x, m_pad)
    out = pl.pallas_call(
        functools.partial(_mm_bias_kernel, relu=relu),
        out_shape=jax.ShapeDtypeStruct((m_pad, n_pad), out_dtype),
        grid=(m_pad // tm,),
        in_specs=[
            pl.BlockSpec((tm, k), lambda i: (i, 0)),
            pl.BlockSpec((k, n_pad), lambda i: (0, 0)),   # resident weight
            pl.BlockSpec((1, n_pad), lambda i: (0, 0)),   # resident bias (f32)
        ],
        out_specs=pl.BlockSpec((tm, n_pad), lambda i: (i, 0)),
        compiler_params=pltpu.CompilerParams(
            dimension_semantics=("parallel",),
            vmem_limit_bytes=_VMEM_LIMIT),
    )(x, w, b_row)
    return out[:m]


def fc_fused(x, w1, b1, w2, b2, *, out_dtype, tm=512):
    """(relu(x @ w1 + b1)) @ w2 + b2 in a single pallas_call."""
    m, k1 = x.shape
    hdim = w1.shape[1]
    n2_pad = w2.shape[1]
    assert hdim % _LANE == 0 and n2_pad % _LANE == 0
    tm = min(tm, _round_up(m, _SUBLANE))
    m_pad = _round_up(m, tm)
    x = _pad_rows(x, m_pad)
    out = pl.pallas_call(
        _fc_fused_kernel,
        out_shape=jax.ShapeDtypeStruct((m_pad, n2_pad), out_dtype),
        grid=(m_pad // tm,),
        in_specs=[
            pl.BlockSpec((tm, k1), lambda i: (i, 0)),
            pl.BlockSpec((k1, hdim), lambda i: (0, 0)),
            pl.BlockSpec((1, hdim), lambda i: (0, 0)),
            pl.BlockSpec((hdim, n2_pad), lambda i: (0, 0)),
            pl.BlockSpec((1, n2_pad), lambda i: (0, 0)),
        ],
        out_specs=pl.BlockSpec((tm, n2_pad), lambda i: (i, 0)),
        compiler_params=pltpu.CompilerParams(
            dimension_semantics=("parallel",),
            vmem_limit_bytes=_VMEM_LIMIT),
    )(x, w1, b1, w2, b2)
    return out[:m]


# ----------------------------------------------------------------------------
# im2col glue (NHWC, transpose-free).  Pure data movement, stays in plain JAX.
# TODO(synk): fuse the patch gather into the Pallas kernel (in-kernel strided
#             loads / Element index_map) so the k*k-expanded patch matrix
#             never hits HBM.
# ----------------------------------------------------------------------------
def _im2col_nhwc(x_nhwc, k, s):
    n, h, w, c = x_nhwc.shape
    oh = (h - k) // s + 1
    ow = (w - k) // s + 1
    cols = [x_nhwc[:, i:i + s * oh:s, j:j + s * ow:s, :]
            for i in range(k) for j in range(k)]
    patches = jnp.stack(cols, axis=3)             # (N, OH, OW, k*k, C)
    return patches.reshape(n * oh * ow, k * k * c), oh, ow


def conv2d_pallas(x_nhwc, w_mat, b_row, *, oc, k, stride, relu, out_dtype):
    """VALID conv (NHWC in / NHWC out) == im2col + lane-dense Pallas matmul."""
    n = x_nhwc.shape[0]
    patches, oh, ow = _im2col_nhwc(x_nhwc, k, stride)
    out = matmul_bias(patches, w_mat, b_row, relu=relu, out_dtype=out_dtype)
    return out[:, :oc].reshape(n, oh, ow, oc)


# ----------------------------------------------------------------------------
# DQN module: parameters (torch layout), one-time kernel-layout prep, forward
# ----------------------------------------------------------------------------
_CONV_CFG = ((32, 8, 4, True), (64, 4, 2, True), (64, 3, 1, False))  # oc,k,s,relu


def conv_out_shape(input_shape):
    c, h, w = input_shape
    h1, w1 = (h - 8) // 4 + 1, (w - 8) // 4 + 1
    h2, w2 = (h1 - 4) // 2 + 1, (w1 - 4) // 2 + 1
    h3, w3 = (h2 - 3) // 1 + 1, (w2 - 3) // 1 + 1
    return 64, h3, w3


def init_dqn_params(key, input_shape, n_action):
    c_in = input_shape[0]
    co, ho, wo = conv_out_shape(input_shape)
    conv_out_size = co * ho * wo

    def dense(k, shape, fan_in):
        return (jax.random.normal(k, shape, dtype=jnp.float32)
                * (1.0 / jnp.sqrt(jnp.float32(fan_in))))

    keys = jax.random.split(key, 10)
    return {
        "conv1_w": dense(keys[0], (32, c_in, 8, 8), c_in * 64),
        "conv1_b": dense(keys[1], (32,), c_in * 64),
        "conv2_w": dense(keys[2], (64, 32, 4, 4), 32 * 16),
        "conv2_b": dense(keys[3], (64,), 32 * 16),
        "conv3_w": dense(keys[4], (64, 64, 3, 3), 64 * 9),
        "conv3_b": dense(keys[5], (64,), 64 * 9),
        "fc1_w": dense(keys[6], (512, conv_out_size), conv_out_size),
        "fc1_b": dense(keys[7], (512,), conv_out_size),
        "fc2_w": dense(keys[8], (n_action, 512), 512),
        "fc2_b": dense(keys[9], (n_action,), 512),
    }


def prepare_params(params, input_shape, compute_dtype=jnp.bfloat16):
    """Hoist all weight relayouts out of the forward path (run once).

    Conv weights -> (KH*KW*IC, OCpad128) in (kh, kw, ic) order, matching the
    NHWC im2col.  fc1 weight absorbs the NCHW->NHWC flatten permutation.
    fc weights stored (in, out); small output dims zero-padded to 128 lanes.
    """
    c3, h3, w3 = conv_out_shape(input_shape)

    def prep_conv(w_oihw, b):
        oc, ic, kh, kw = w_oihw.shape
        w_mat = w_oihw.transpose(2, 3, 1, 0).reshape(kh * kw * ic, oc)
        ocp = _round_up(oc, _LANE)
        w_mat = jnp.pad(w_mat, ((0, 0), (0, ocp - oc))).astype(compute_dtype)
        b_row = jnp.pad(b, (0, ocp - oc)).reshape(1, ocp).astype(jnp.float32)
        return w_mat, b_row

    prep = {}
    prep["conv1_w"], prep["conv1_b"] = prep_conv(params["conv1_w"], params["conv1_b"])
    prep["conv2_w"], prep["conv2_b"] = prep_conv(params["conv2_w"], params["conv2_b"])
    prep["conv3_w"], prep["conv3_b"] = prep_conv(params["conv3_w"], params["conv3_b"])

    hidden = params["fc1_w"].shape[0]
    # fc1 columns are ordered (c, h, w) by torch's NCHW flatten; permute to the
    # (h, w, c) order produced by our NHWC flatten, then store as (in, out).
    fc1_w = params["fc1_w"].reshape(hidden, c3, h3, w3).transpose(0, 2, 3, 1)
    prep["fc1_w"] = fc1_w.reshape(hidden, h3 * w3 * c3).T.astype(compute_dtype)
    prep["fc1_b"] = params["fc1_b"].reshape(1, hidden).astype(jnp.float32)

    n_action = params["fc2_w"].shape[0]
    nap = _round_up(n_action, _LANE)
    prep["fc2_w"] = jnp.pad(params["fc2_w"].T,
                            ((0, 0), (0, nap - n_action))).astype(compute_dtype)
    prep["fc2_b"] = jnp.pad(params["fc2_b"],
                            (0, nap - n_action)).reshape(1, nap).astype(jnp.float32)
    return prep


def dqn_forward(prep, x_nchw, *, n_action):
    compute_dtype = prep["conv1_w"].dtype
    # Single NCHW -> NHWC conversion at the module boundary.
    h = jnp.transpose(x_nchw, (0, 2, 3, 1)).astype(compute_dtype)
    for li, (oc, k, s, relu) in enumerate(_CONV_CFG, start=1):
        h = conv2d_pallas(h, prep[f"conv{li}_w"], prep[f"conv{li}_b"],
                          oc=oc, k=k, stride=s, relu=relu,
                          out_dtype=compute_dtype)
    flat = h.reshape(h.shape[0], -1)   # NHWC flatten; fc1_w was permuted for it
    out = fc_fused(flat, prep["fc1_w"], prep["fc1_b"],
                   prep["fc2_w"], prep["fc2_b"], out_dtype=jnp.float32)
    return out[:, :n_action]


# ----------------------------------------------------------------------------
# Pure-JAX reference (lax.conv) for the correctness check.
# ----------------------------------------------------------------------------
def dqn_reference(params, x):
    def conv(x, w, b, s):
        y = lax.conv_general_dilated(
            x, w, window_strides=(s, s), padding="VALID",
            dimension_numbers=("NCHW", "OIHW", "NCHW"))
        return y + b.reshape(1, -1, 1, 1)

    h = jnp.maximum(conv(x, params["conv1_w"], params["conv1_b"], 4), 0.0)
    h = jnp.maximum(conv(h, params["conv2_w"], params["conv2_b"], 2), 0.0)
    h = conv(h, params["conv3_w"], params["conv3_b"], 1)
    flat = h.reshape(h.shape[0], -1)
    h = jnp.maximum(flat @ params["fc1_w"].T + params["fc1_b"], 0.0)
    return h @ params["fc2_w"].T + params["fc2_b"]


if __name__ == "__main__":
    # spatial=52 -> conv out 64 x 3 x 3 (exercises the NHWC flatten permutation)
    batch, channels, spatial, n_action = 2, 4, 52, 6
    input_shape = (channels, spatial, spatial)

    key = jax.random.PRNGKey(0)
    k_param, k_x = jax.random.split(key)
    params = init_dqn_params(k_param, input_shape, n_action)
    x = jax.random.normal(k_x, (batch, channels, spatial, spatial),
                          dtype=jnp.float32)

    ref = jax.block_until_ready(dqn_reference(params, x))

    fwd = jax.jit(functools.partial(dqn_forward, n_action=n_action))

    # 1) float32 compute path: tight check of the kernel math / layout plumbing.
    prep_f32 = prepare_params(params, input_shape, compute_dtype=jnp.float32)
    out_f32 = jax.block_until_ready(fwd(prep_f32, x))
    assert out_f32.shape == (batch, n_action), out_f32.shape
    assert jnp.allclose(out_f32, ref, atol=2e-3, rtol=2e-3), (
        float(jnp.max(jnp.abs(out_f32 - ref))))

    # 2) bfloat16 MXU path (deployment default): loose consistency check.
    prep_bf16 = prepare_params(params, input_shape, compute_dtype=jnp.bfloat16)
    out_bf16 = jax.block_until_ready(fwd(prep_bf16, x))
    assert out_bf16.shape == (batch, n_action), out_bf16.shape
    assert jnp.allclose(out_bf16, ref, atol=1e-1, rtol=1e-1), (
        float(jnp.max(jnp.abs(out_bf16 - ref))))

    print("KERNEL_OK")
</pallas_src>

<mosaic_0001>
module attributes {stable_mosaic.version = 11 : i64} {
  func.func @_mm_bias_kernel(%arg0: i32, %arg1: memref<288x256xf32, #tpu.memory_space<vmem>>, %arg2: memref<256x128xf32, #tpu.memory_space<vmem>>, %arg3: memref<1x128xf32, #tpu.memory_space<vmem>>, %arg4: memref<288x128xf32, #tpu.memory_space<vmem>>) attributes {dimension_semantics = [#tpu.dimension_semantics<parallel>], iteration_bounds = array<i64: 1>, scalar_prefetch = 0 : i64, scratch_operands = 0 : i64, tpu.core_type = #tpu.core_type<tc>, window_params = [{transform_indices = @transform_0, window_bounds = array<i64: 288, 256>}, {pipeline_mode = #tpu.pipeline_mode<synchronous>, transform_indices = @transform_1, window_bounds = array<i64: 256, 128>}, {pipeline_mode = #tpu.pipeline_mode<synchronous>, transform_indices = @transform_2, window_bounds = array<i64: 1, 128>}, {transform_indices = @transform_3, window_bounds = array<i64: 288, 128>}]} {
    %c0 = arith.constant 0 : index
    %c0_0 = arith.constant 0 : index
    %0 = vector.load %arg1[%c0, %c0_0] : memref<288x256xf32, #tpu.memory_space<vmem>>, vector<288x256xf32>
    %c0_1 = arith.constant 0 : index
    %c0_2 = arith.constant 0 : index
    %1 = vector.load %arg2[%c0_1, %c0_2] : memref<256x128xf32, #tpu.memory_space<vmem>>, vector<256x128xf32>
    %cst = arith.constant dense<0.000000e+00> : vector<288x128xf32>
    %2 = tpu.matmul %0, %1, %cst {dimension_numbers = #tpu.dot_dimension_numbers<[1], [0], [0], [1], [0, 0, 1, 1], [], []>} : vector<288x256xf32>, vector<256x128xf32>, vector<288x128xf32> -> vector<288x128xf32>
    %c0_3 = arith.constant 0 : index
    %c0_4 = arith.constant 0 : index
    %3 = vector.load %arg3[%c0_3, %c0_4] : memref<1x128xf32, #tpu.memory_space<vmem>>, vector<1x128xf32>
    %4 = vector.broadcast %3 : vector<1x128xf32> to vector<288x128xf32>
    %5 = arith.addf %2, %4 : vector<288x128xf32>
    %cst_5 = arith.constant 0.000000e+00 : f32
    %6 = vector.broadcast %cst_5 : f32 to vector<288x128xf32>
    %7 = arith.maximumf %5, %6 : vector<288x128xf32>
    %c0_6 = arith.constant 0 : index
    %c0_7 = arith.constant 0 : index
    %8 = vector.load %arg4[%c0_6, %c0_7] : memref<288x128xf32, #tpu.memory_space<vmem>>, vector<288x128xf32>
    tpu.vector_store %arg4[%c0_6, %c0_7], %7 {strides = array<i32>} : memref<288x128xf32, #tpu.memory_space<vmem>>, vector<288x128xf32>,
    return
  }
  func.func @transform_0(%arg0: i32) -> (i32, i32) {
    %c0_i32 = arith.constant 0 : i32
    %c0_i32_0 = arith.constant 0 : i32
    return %arg0, %c0_i32 : i32, i32
  }
  func.func @transform_1(%arg0: i32) -> (i32, i32) {
    %c0_i32 = arith.constant 0 : i32
    %c0_i32_0 = arith.constant 0 : i32
    %c0_i32_1 = arith.constant 0 : i32
    return %c0_i32, %c0_i32_0 : i32, i32
  }
  func.func @transform_2(%arg0: i32) -> (i32, i32) {
    %c0_i32 = arith.constant 0 : i32
    %c0_i32_0 = arith.constant 0 : i32
    %c0_i32_1 = arith.constant 0 : i32
    return %c0_i32, %c0_i32_0 : i32, i32
  }
  func.func @transform_3(%arg0: i32) -> (i32, i32) {
    %c0_i32 = arith.constant 0 : i32
    %c0_i32_0 = arith.constant 0 : i32
    return %arg0, %c0_i32 : i32, i32
  }
}

module attributes {stable_mosaic.version = 11 : i64} {
  func.func @_mm_bias_kernel(%arg0: i32, %arg1: memref<56x512xf32, #tpu.memory_space<vmem>>, %arg2: memref<512x128xf32, #tpu.memory_space<vmem>>, %arg3: memref<1x128xf32, #tpu.memory_space<vmem>>, %arg4: memref<56x128xf32, #tpu.memory_space<vmem>>) attributes {dimension_semantics = [#tpu.dimension_semantics<parallel>], iteration_bounds = array<i64: 1>, scalar_prefetch = 0 : i64, scratch_operands = 0 : i64, tpu.core_type = #tpu.core_type<tc>, window_params = [{transform_indices = @transform_0, window_bounds = array<i64: 56, 512>}, {pipeline_mode = #tpu.pipeline_mode<synchronous>, transform_indices = @transform_1, window_bounds = array<i64: 512, 128>}, {pipeline_mode = #tpu.pipeline_mode<synchronous>, transform_indices = @transform_2, window_bounds = array<i64: 1, 128>}, {transform_indices = @transform_3, window_bounds = array<i64: 56, 128>}]} {
    %c0 = arith.constant 0 : index
    %c0_0 = arith.constant 0 : index
    %0 = vector.load %arg1[%c0, %c0_0] : memref<56x512xf32, #tpu.memory_space<vmem>>, vector<56x512xf32>
    %c0_1 = arith.constant 0 : index
    %c0_2 = arith.constant 0 : index
    %1 = vector.load %arg2[%c0_1, %c0_2] : memref<512x128xf32, #tpu.memory_space<vmem>>, vector<512x128xf32>
    %cst = arith.constant dense<0.000000e+00> : vector<56x128xf32>
    %2 = tpu.matmul %0, %1, %cst {dimension_numbers = #tpu.dot_dimension_numbers<[1], [0], [0], [1], [0, 0, 1, 1], [], []>} : vector<56x512xf32>, vector<512x128xf32>, vector<56x128xf32> -> vector<56x128xf32>
    %c0_3 = arith.constant 0 : index
    %c0_4 = arith.constant 0 : index
    %3 = vector.load %arg3[%c0_3, %c0_4] : memref<1x128xf32, #tpu.memory_space<vmem>>, vector<1x128xf32>
    %4 = vector.broadcast %3 : vector<1x128xf32> to vector<56x128xf32>
    %5 = arith.addf %2, %4 : vector<56x128xf32>
    %cst_5 = arith.constant 0.000000e+00 : f32
    %6 = vector.broadcast %cst_5 : f32 to vector<56x128xf32>
    %7 = arith.maximumf %5, %6 : vector<56x128xf32>
    %c0_6 = arith.constant 0 : index
    %c0_7 = arith.constant 0 : index
    %8 = vector.load %arg4[%c0_6, %c0_7] : memref<56x128xf32, #tpu.memory_space<vmem>>, vector<56x128xf32>
    tpu.vector_store %arg4[%c0_6, %c0_7], %7 {strides = array<i32>} : memref<56x128xf32, #tpu.memory_space<vmem>>, vector<56x128xf32>,
    return
  }
  func.func @transform_0(%arg0: i32) -> (i32, i32) {
    %c0_i32 = arith.constant 0 : i32
    %c0_i32_0 = arith.constant 0 : i32
    return %arg0, %c0_i32 : i32, i32
  }
  func.func @transform_1(%arg0: i32) -> (i32, i32) {
    %c0_i32 = arith.constant 0 : i32
    %c0_i32_0 = arith.constant 0 : i32
    %c0_i32_1 = arith.constant 0 : i32
    return %c0_i32, %c0_i32_0 : i32, i32
  }
  func.func @transform_2(%arg0: i32) -> (i32, i32) {
    %c0_i32 = arith.constant 0 : i32
    %c0_i32_0 = arith.constant 0 : i32
    %c0_i32_1 = arith.constant 0 : i32
    return %c0_i32, %c0_i32_0 : i32, i32
  }
  func.func @transform_3(%arg0: i32) -> (i32, i32) {
    %c0_i32 = arith.constant 0 : i32
    %c0_i32_0 = arith.constant 0 : i32
    return %arg0, %c0_i32 : i32, i32
  }
}

module attributes {stable_mosaic.version = 11 : i64} {
  func.func @_mm_bias_kernel(%arg0: i32, %arg1: memref<24x576xf32, #tpu.memory_space<vmem>>, %arg2: memref<576x128xf32, #tpu.memory_space<vmem>>, %arg3: memref<1x128xf32, #tpu.memory_space<vmem>>, %arg4: memref<24x128xf32, #tpu.memory_space<vmem>>) attributes {dimension_semantics = [#tpu.dimension_semantics<parallel>], iteration_bounds = array<i64: 1>, scalar_prefetch = 0 : i64, scratch_operands = 0 : i64, tpu.core_type = #tpu.core_type<tc>, window_params = [{transform_indices = @transform_0, window_bounds = array<i64: 24, 576>}, {pipeline_mode = #tpu.pipeline_mode<synchronous>, transform_indices = @transform_1, window_bounds = array<i64: 576, 128>}, {pipeline_mode = #tpu.pipeline_mode<synchronous>, transform_indices = @transform_2, window_bounds = array<i64: 1, 128>}, {transform_indices = @transform_3, window_bounds = array<i64: 24, 128>}]} {
    %c0 = arith.constant 0 : index
    %c0_0 = arith.constant 0 : index
    %0 = vector.load %arg1[%c0, %c0_0] : memref<24x576xf32, #tpu.memory_space<vmem>>, vector<24x576xf32>
    %c0_1 = arith.constant 0 : index
    %c0_2 = arith.constant 0 : index
    %1 = vector.load %arg2[%c0_1, %c0_2] : memref<576x128xf32, #tpu.memory_space<vmem>>, vector<576x128xf32>
    %cst = arith.constant dense<0.000000e+00> : vector<24x128xf32>
    %2 = tpu.matmul %0, %1, %cst {dimension_numbers = #tpu.dot_dimension_numbers<[1], [0], [0], [1], [0, 0, 1, 1], [], []>} : vector<24x576xf32>, vector<576x128xf32>, vector<24x128xf32> -> vector<24x128xf32>
    %c0_3 = arith.constant 0 : index
    %c0_4 = arith.constant 0 : index
    %3 = vector.load %arg3[%c0_3, %c0_4] : memref<1x128xf32, #tpu.memory_space<vmem>>, vector<1x128xf32>
    %4 = vector.broadcast %3 : vector<1x128xf32> to vector<24x128xf32>
    %5 = arith.addf %2, %4 : vector<24x128xf32>
    %c0_5 = arith.constant 0 : index
    %c0_6 = arith.constant 0 : index
    %6 = vector.load %arg4[%c0_5, %c0_6] : memref<24x128xf32, #tpu.memory_space<vmem>>, vector<24x128xf32>
    tpu.vector_store %arg4[%c0_5, %c0_6], %5 {strides = array<i32>} : memref<24x128xf32, #tpu.memory_space<vmem>>, vector<24x128xf32>,
    return
  }
  func.func @transform_0(%arg0: i32) -> (i32, i32) {
    %c0_i32 = arith.constant 0 : i32
    %c0_i32_0 = arith.constant 0 : i32
    return %arg0, %c0_i32 : i32, i32
  }
  func.func @transform_1(%arg0: i32) -> (i32, i32) {
    %c0_i32 = arith.constant 0 : i32
    %c0_i32_0 = arith.constant 0 : i32
    %c0_i32_1 = arith.constant 0 : i32
    return %c0_i32, %c0_i32_0 : i32, i32
  }
  func.func @transform_2(%arg0: i32) -> (i32, i32) {
    %c0_i32 = arith.constant 0 : i32
    %c0_i32_0 = arith.constant 0 : i32
    %c0_i32_1 = arith.constant 0 : i32
    return %c0_i32, %c0_i32_0 : i32, i32
  }
  func.func @transform_3(%arg0: i32) -> (i32, i32) {
    %c0_i32 = arith.constant 0 : i32
    %c0_i32_0 = arith.constant 0 : i32
    return %arg0, %c0_i32 : i32, i32
  }
}

module attributes {stable_mosaic.version = 11 : i64} {
  func.func @_fc_fused_kernel(%arg0: i32, %arg1: memref<8x576xf32, #tpu.memory_space<vmem>>, %arg2: memref<576x512xf32, #tpu.memory_space<vmem>>, %arg3: memref<1x512xf32, #tpu.memory_space<vmem>>, %arg4: memref<512x128xf32, #tpu.memory_space<vmem>>, %arg5: memref<1x128xf32, #tpu.memory_space<vmem>>, %arg6: memref<8x128xf32, #tpu.memory_space<vmem>>) attributes {dimension_semantics = [#tpu.dimension_semantics<parallel>], iteration_bounds = array<i64: 1>, scalar_prefetch = 0 : i64, scratch_operands = 0 : i64, tpu.core_type = #tpu.core_type<tc>, window_params = [{transform_indices = @transform_0, window_bounds = array<i64: 8, 576>}, {pipeline_mode = #tpu.pipeline_mode<synchronous>, transform_indices = @transform_1, window_bounds = array<i64: 576, 512>}, {pipeline_mode = #tpu.pipeline_mode<synchronous>, transform_indices = @transform_2, window_bounds = array<i64: 1, 512>}, {pipeline_mode = #tpu.pipeline_mode<synchronous>, transform_indices = @transform_3, window_bounds = array<i64: 512, 128>}, {pipeline_mode = #tpu.pipeline_mode<synchronous>, transform_indices = @transform_4, window_bounds = array<i64: 1, 128>}, {transform_indices = @transform_5, window_bounds = array<i64: 8, 128>}]} {
    %c0 = arith.constant 0 : index
    %c0_0 = arith.constant 0 : index
    %0 = vector.load %arg1[%c0, %c0_0] : memref<8x576xf32, #tpu.memory_space<vmem>>, vector<8x576xf32>
    %c0_1 = arith.constant 0 : index
    %c0_2 = arith.constant 0 : index
    %1 = vector.load %arg2[%c0_1, %c0_2] : memref<576x512xf32, #tpu.memory_space<vmem>>, vector<576x512xf32>
    %cst = arith.constant dense<0.000000e+00> : vector<8x512xf32>
    %2 = tpu.matmul %0, %1, %cst {dimension_numbers = #tpu.dot_dimension_numbers<[1], [0], [0], [1], [0, 0, 1, 1], [], []>} : vector<8x576xf32>, vector<576x512xf32>, vector<8x512xf32> -> vector<8x512xf32>
    %c0_3 = arith.constant 0 : index
    %c0_4 = arith.constant 0 : index
    %3 = vector.load %arg3[%c0_3, %c0_4] : memref<1x512xf32, #tpu.memory_space<vmem>>, vector<1x512xf32>
    %4 = vector.broadcast %3 : vector<1x512xf32> to vector<8x512xf32>
    %5 = arith.addf %2, %4 : vector<8x512xf32>
    %cst_5 = arith.constant 0.000000e+00 : f32
    %6 = vector.broadcast %cst_5 : f32 to vector<8x512xf32>
    %7 = arith.maximumf %5, %6 : vector<8x512xf32>
    %c0_6 = arith.constant 0 : index
    %c0_7 = arith.constant 0 : index
    %8 = vector.load %arg4[%c0_6, %c0_7] : memref<512x128xf32, #tpu.memory_space<vmem>>, vector<512x128xf32>
    %cst_8 = arith.constant dense<0.000000e+00> : vector<8x128xf32>
    %9 = tpu.matmul %7, %8, %cst_8 {dimension_numbers = #tpu.dot_dimension_numbers<[1], [0], [0], [1], [0, 0, 1, 1], [], []>} : vector<8x512xf32>, vector<512x128xf32>, vector<8x128xf32> -> vector<8x128xf32>
    %c0_9 = arith.constant 0 : index
    %c0_10 = arith.constant 0 : index
    %10 = vector.load %arg5[%c0_9, %c0_10] : memref<1x128xf32, #tpu.memory_space<vmem>>, vector<1x128xf32>
    %11 = vector.broadcast %10 : vector<1x128xf32> to vector<8x128xf32>
    %12 = arith.addf %9, %11 : vector<8x128xf32>
    %c0_11 = arith.constant 0 : index
    %c0_12 = arith.constant 0 : index
    %13 = vector.load %arg6[%c0_11, %c0_12] : memref<8x128xf32, #tpu.memory_space<vmem>>, vector<8x128xf32>
    tpu.vector_store %arg6[%c0_11, %c0_12], %12 {strides = array<i32>} : memref<8x128xf32, #tpu.memory_space<vmem>>, vector<8x128xf32>,
    return
  }
  func.func @transform_0(%arg0: i32) -> (i32, i32) {
    %c0_i32 = arith.constant 0 : i32
    %c0_i32_0 = arith.constant 0 : i32
    return %arg0, %c0_i32 : i32, i32
  }
  func.func @transform_1(%arg0: i32) -> (i32, i32) {
    %c0_i32 = arith.constant 0 : i32
    %c0_i32_0 = arith.constant 0 : i32
    %c0_i32_1 = arith.constant 0 : i32
    return %c0_i32, %c0_i32_0 : i32, i32
  }
  func.func @transform_2(%arg0: i32) -> (i32, i32) {
    %c0_i32 = arith.constant 0 : i32
    %c0_i32_0 = arith.constant 0 : i32
    %c0_i32_1 = arith.constant 0 : i32
    return %c0_i32, %c0_i32_0 : i32, i32
  }
  func.func @transform_3(%arg0: i32) -> (i32, i32) {
    %c0_i32 = arith.constant 0 : i32
    %c0_i32_0 = arith.constant 0 : i32
    %c0_i32_1 = arith.constant 0 : i32
    return %c0_i32, %c0_i32_0 : i32, i32
  }
  func.func @transform_4(%arg0: i32) -> (i32, i32) {
    %c0_i32 = arith.constant 0 : i32
    %c0_i32_0 = arith.constant 0 : i32
    %c0_i32_1 = arith.constant 0 : i32
    return %c0_i32, %c0_i32_0 : i32, i32
  }
  func.func @transform_5(%arg0: i32) -> (i32, i32) {
    %c0_i32 = arith.constant 0 : i32
    %c0_i32_0 = arith.constant 0 : i32
    return %arg0, %c0_i32 : i32, i32
  }
}

</mosaic_0001>

<bundles_post_ra>
// kernel: dqn_forward.4
= control target key start
LH: loop header
LB: loop body
LE: loop exit
PB: predicated region body
PF: predicated region fallthrough
CT: control target
= control target key end

     0   :  { %v528_v0 = vmov 0.0|0.0   ;;  %s1042_s1 = inlined_call_operand.vmem [shape: f32[256,128], index: 1, kind: input, shape index: {}]   ;;  %s1043_s0 = inlined_call_operand.vmem [shape: f32[288,256], index: 0, kind: input, shape index: {}]   ;;  %s1044_s2 = inlined_call_operand.vmem [shape: f32[1,128], index: 2, kind: input, shape index: {}]   ;;  %s1045_s3 = inlined_call_operand.vmem [shape: f32[288,128], index: 3, kind: output, shape index: {}]  }
   0x1   :  { %447 = vmatprep.subr.bf16.mxu0 %v528_v0  ;;  %495 = vmatprep.subr.bf16.mxu1 %v528_v0  ;;  %v86_v1 = vld [vmem:[%s1042_s1] sm:$0xff]  ;;  %v87_v2 = vld [vmem:[%s1042_s1 + $0x8] sm:$0xff]  ;;  %v88_v3 = vld [vmem:[%s1042_s1 + $0x10] sm:$0xff] }
   0x2   :  { %v448_v4 = vpack.c.bf16 %v87_v2, %v86_v1  ;;  %v89_v5 = vld [vmem:[%s1042_s1 + $0x18] sm:$0xff]  ;;  %v90_v7 = vld [vmem:[%s1042_s1 + $0x20] sm:$0xff]  ;;  %v91_v8 = vld [vmem:[%s1042_s1 + $0x28] sm:$0xff] }
   0x3   :  { %v451_v6 = vpack.c.bf16 %v89_v5, %v88_v3  ;;  %v454_v9 = vpack.c.bf16 %v91_v8, %v90_v7  ;;  %v92_v10 = vld [vmem:[%s1042_s1 + $0x30] sm:$0xff]  ;;  %v93_v11 = vld [vmem:[%s1042_s1 + $0x38] sm:$0xff]  ;;  %v15_v12 = vld [vmem:[%s1043_s0 + $0x8] sm:$0xff] }
   0x4   :  { %449 = vmatpush1.bf16.msra.mxu0 %v448_v4  ;;  %511 = vmatpush1.bf16.msra.mxu1 %v448_v4  ;;  %v457_v13 = vpack.c.bf16 %v93_v11, %v92_v10  ;;  %v51_v14 = vld [vmem:[%s1043_s0 + $0x128] sm:$0xff]  ;;  %v94_v15 = vld [vmem:[%s1042_s1 + $0x40] sm:$0xff]  ;;  %v96_v18 = vld [vmem:[%s1042_s1 + $0x50] sm:$0xff] }
   0x5   :  { %450 = vmatprep.subr.bf16.mxu0 %v528_v0  ;;  %496 = vmatprep.subr.bf16.mxu1 %v528_v0  ;;  %v95_v16 = vld [vmem:[%s1042_s1 + $0x48] sm:$0xff]  ;;  %v97_v19 = vld [vmem:[%s1042_s1 + $0x58] sm:$0xff]  ;;  %v98_v21 = vld [vmem:[%s1042_s1 + $0x60] sm:$0xff] }
   0x6   :  { %189 = vmatprep.mubr.f32.mxu0 %v15_v12  ;;  %279 = vmatprep.mubr.f32.mxu1 %v51_v14  ;;  %v460_v17 = vpack.c.bf16 %v95_v16, %v94_v15  ;;  %v463_v20 = vpack.c.bf16 %v97_v19, %v96_v18  ;;  %v99_v22 = vld [vmem:[%s1042_s1 + $0x68] sm:$0xff]  ;;  %v100_v24 = vld [vmem:[%s1042_s1 + $0x70] sm:$0xff]  ;;  %v101_v25 = vld [vmem:[%s1042_s1 + $0x78] sm:$0xff] }
   0x7   :  { %v466_v23 = vpack.c.bf16 %v99_v22, %v98_v21  ;;  %v469_v26 = vpack.c.bf16 %v101_v25, %v100_v24  ;;  %v102_v27 = vld [vmem:[%s1042_s1 + $0x80] sm:$0xff]  ;;  %v103_v28 = vld [vmem:[%s1042_s1 + $0x88] sm:$0xff]  ;;  %v104_v30 = vld [vmem:[%s1042_s1 + $0x90] sm:$0xff] }
   0x8   :  { %452 = vmatpush1.bf16.msra.mxu0 %v451_v6  ;;  %512 = vmatpush1.bf16.msra.mxu1 %v451_v6  ;;  %v472_v29 = vpack.c.bf16 %v103_v28, %v102_v27  ;;  %v105_v31 = vld [vmem:[%s1042_s1 + $0x98] sm:$0xff]  ;;  %v106_v33 = vld [vmem:[%s1042_s1 + $0xa0] sm:$0xff]  ;;  %v107_v34 = vld [vmem:[%s1042_s1 + $0xa8] sm:$0xff] }
   0x9   :  { %453 = vmatprep.subr.bf16.mxu0 %v528_v0  ;;  %497 = vmatprep.subr.bf16.mxu1 %v528_v0  ;;  %v475_v32 = vpack.c.bf16 %v105_v31, %v104_v30  ;;  %v478_v35 = vpack.c.bf16 %v107_v34, %v106_v33  ;;  %v108_v36 = vld [vmem:[%s1042_s1 + $0xb0] sm:$0xff]  ;;  %v109_v37 = vld [vmem:[%s1042_s1 + $0xb8] sm:$0xff]  ;;  %v110_v39 = vld [vmem:[%s1042_s1 + $0xc0] sm:$0xff] }
   0xa   :  { %v481_v38 = vpack.c.bf16 %v109_v37, %v108_v36  ;;  %v111_v40 = vld [vmem:[%s1042_s1 + $0xc8] sm:$0xff]  ;;  %v112_v42 = vld [vmem:[%s1042_s1 + $0xd0] sm:$0xff]  ;;  %v113_v43 = vld [vmem:[%s1042_s1 + $0xd8] sm:$0xff] }
   0xb   :  { %v484_v41 = vpack.c.bf16 %v111_v40, %v110_v39  ;;  %v487_v44 = vpack.c.bf16 %v113_v43, %v112_v42  ;;  %v114_v45 = vld [vmem:[%s1042_s1 + $0xe0] sm:$0xff]  ;;  %v115_v46 = vld [vmem:[%s1042_s1 + $0xe8] sm:$0xff]  ;;  %v116_v48 = vld [vmem:[%s1042_s1 + $0xf0] sm:$0xff] }
   0xc   :  { %455 = vmatpush1.bf16.msra.mxu0 %v454_v9  ;;  %513 = vmatpush1.bf16.msra.mxu1 %v454_v9  ;;  %v490_v47 = vpack.c.bf16 %v115_v46, %v114_v45  ;;  %v117_v49 = vld [vmem:[%s1042_s1 + $0xf8] sm:$0xff]  ;;  %v14_v51 = vld [vmem:[%s1043_s0] sm:$0xff]  ;;  %v16_v55 = vld [vmem:[%s1043_s0 + $0x10] sm:$0xff] }
   0xd   :  { %456 = vmatprep.subr.bf16.mxu0 %v528_v0  ;;  %498 = vmatprep.subr.bf16.mxu1 %v528_v0  ;;  %v493_v50 = vpack.c.bf16 %v117_v49, %v116_v48  ;;  %v50_v52 = vld [vmem:[%s1043_s0 + $0x120] sm:$0xff]  ;;  %v17_v53 = vld [vmem:[%s1043_s0 + $0x18] sm:$0xff]  ;;  %v52_v56 = vld [vmem:[%s1043_s0 + $0x130] sm:$0xff] }
   0xe   :  { %v53_v54 = vld [vmem:[%s1043_s0 + $0x138] sm:$0xff]  ;;  %v19_v57 = vld [vmem:[%s1043_s0 + $0x28] sm:$0xff]  ;;  %v18_v59 = vld [vmem:[%s1043_s0 + $0x20] sm:$0xff] }
   0xf   :  { %v55_v58 = vld [vmem:[%s1043_s0 + $0x148] sm:$0xff]  ;;  %v54_v60 = vld [vmem:[%s1043_s0 + $0x140] sm:$0xff]  ;;  %v21_v61 = vld [vmem:[%s1043_s0 + $0x38] sm:$0xff] }
  0x10   :  { %458 = vmatpush1.bf16.msra.mxu0 %v457_v13  ;;  %514 = vmatpush1.bf16.msra.mxu1 %v457_v13  ;;  %v57_v62 = vld [vmem:[%s1043_s0 + $0x158] sm:$0xff]  ;;  %v20_v63 = vld [vmem:[%s1043_s0 + $0x30] sm:$0xff]  ;;  %v23_v1 = vld [vmem:[%s1043_s0 + $0x48] sm:$0xff] }
  0x11   :  { %459 = vmatprep.subr.bf16.mxu0 %v528_v0  ;;  %499 = vmatprep.subr.bf16.mxu1 %v528_v0  ;;  %v59_v2 = vld [vmem:[%s1043_s0 + $0x168] sm:$0xff]  ;;  %v22_v3 = vld [vmem:[%s1043_s0 + $0x40] sm:$0xff]  ;;  %v25_v5 = vld [vmem:[%s1043_s0 + $0x58] sm:$0xff] }
  0x12   :  { %v58_v4 = vld [vmem:[%s1043_s0 + $0x160] sm:$0xff]  ;;  %v61_v6 = vld [vmem:[%s1043_s0 + $0x178] sm:$0xff]  ;;  %v24_v7 = vld [vmem:[%s1043_s0 + $0x50] sm:$0xff] }
  0x13   :  { %v60_v8 = vld [vmem:[%s1043_s0 + $0x170] sm:$0xff]  ;;  %v27_v9 = vld [vmem:[%s1043_s0 + $0x68] sm:$0xff]  ;;  %v26_v11 = vld [vmem:[%s1043_s0 + $0x60] sm:$0xff] }
  0x14   :  { %461 = vmatpush1.bf16.msra.mxu0 %v460_v17  ;;  %515 = vmatpush1.bf16.msra.mxu1 %v460_v17  ;;  %v63_v10 = vld [vmem:[%s1043_s0 + $0x188] sm:$0xff]  ;;  %v62_v12 = vld [vmem:[%s1043_s0 + $0x180] sm:$0xff]  ;;  %v29_v13 = vld [vmem:[%s1043_s0 + $0x78] sm:$0xff] }
  0x15   :  { %462 = vmatprep.subr.bf16.mxu0 %v528_v0  ;;  %500 = vmatprep.subr.bf16.mxu1 %v528_v0  ;;  %v65_v14 = vld [vmem:[%s1043_s0 + $0x198] sm:$0xff]  ;;  %v28_v15 = vld [vmem:[%s1043_s0 + $0x70] sm:$0xff]  ;;  %v31_v17 = vld [vmem:[%s1043_s0 + $0x88] sm:$0xff] }
  0x16   :  { %v64_v16 = vld [vmem:[%s1043_s0 + $0x190] sm:$0xff]  ;;  %v67_v18 = vld [vmem:[%s1043_s0 + $0x1a8] sm:$0xff]  ;;  %v30_v19 = vld [vmem:[%s1043_s0 + $0x80] sm:$0xff] }
  0x17   :  { %v33_v21 = vld [vmem:[%s1043_s0 + $0x98] sm:$0xff]  ;;  %v68_v24 = vld [vmem:[%s1043_s0 + $0x1b0] sm:$0xff]  ;;  %v35_v25 = vld [vmem:[%s1043_s0 + $0xa8] sm:$0xff] }
  0x18   :  { %464 = vmatpush1.bf16.msra.mxu0 %v463_v20  ;;  %516 = vmatpush1.bf16.msra.mxu1 %v463_v20  ;;  %v66_v20 = vld [vmem:[%s1043_s0 + $0x1a0] sm:$0xff]  ;;  %v69_v22 = vld [vmem:[%s1043_s0 + $0x1b8] sm:$0xff]  ;;  %v36_v31 = vld [vmem:[%s1043_s0 + $0xb0] sm:$0xff] }
  0x19   :  { %465 = vmatprep.subr.bf16.mxu0 %v528_v0  ;;  %501 = vmatprep.subr.bf16.mxu1 %v528_v0  ;;  %v34_v27 = vld [vmem:[%s1043_s0 + $0xa0] sm:$0xff]  ;;  %v73_v30 = vld [vmem:[%s1043_s0 + $0x1d8] sm:$0xff]  ;;  %v39_v33 = vld [vmem:[%s1043_s0 + $0xc8] sm:$0xff] }
  0x1a   :  { %v70_v28 = vld [vmem:[%s1043_s0 + $0x1c0] sm:$0xff]  ;;  %v75_v34 = vld [vmem:[%s1043_s0 + $0x1e8] sm:$0xff]  ;;  %v41_v37 = vld [vmem:[%s1043_s0 + $0xd8] sm:$0xff] }
  0x1b   :  { %v74_v36 = vld [vmem:[%s1043_s0 + $0x1e0] sm:$0xff]  ;;  %v40_v39 = vld [vmem:[%s1043_s0 + $0xd0] sm:$0xff]  ;;  %v79_v42 = vld [vmem:[%s1043_s0 + $0x208] sm:$0xff] }
  0x1c   :  { %467 = vmatpush1.bf16.msra.mxu0 %v466_v23  ;;  %517 = vmatpush1.bf16.msra.mxu1 %v466_v23  ;;  %v32_v23 = vld [vmem:[%s1043_s0 + $0x90] sm:$0xff]  ;;  %v42_v43 = vld [vmem:[%s1043_s0 + $0xe0] sm:$0xff]  ;;  %v45_v45 = vld [vmem:[%s1043_s0 + $0xf8] sm:$0xff] }
  0x1d   :  { %468 = vmatprep.subr.bf16.mxu0 %v528_v0  ;;  %502 = vmatprep.subr.bf16.mxu1 %v528_v0  ;;  %v76_v40 = vld [vmem:[%s1043_s0 + $0x1f0] sm:$0xff]  ;;  %v81_v46 = vld [vmem:[%s1043_s0 + $0x218] sm:$0xff]  ;;  %v47_v49 = vld [vmem:[%s1043_s0 + $0x108] sm:$0xff] }
  0x1e   :  { %v80_v48 = vld [vmem:[%s1043_s0 + $0x210] sm:$0xff] }
  0x20   :  { %470 = vmatpush1.bf16.msra.mxu0 %v469_v26  ;;  %518 = vmatpush1.bf16.msra.mxu1 %v469_v26  ;;  %v71_v26 = vld [vmem:[%s1043_s0 + $0x1c8] sm:$0xff] }
  0x21   :  { %471 = vmatprep.subr.bf16.mxu0 %v528_v0  ;;  %503 = vmatprep.subr.bf16.mxu1 %v528_v0 }
  0x24   :  { %473 = vmatpush1.bf16.msra.mxu0 %v472_v29  ;;  %519 = vmatpush1.bf16.msra.mxu1 %v472_v29  ;;  %v37_v29 = vld [vmem:[%s1043_s0 + $0xb8] sm:$0xff] }
  0x25   :  { %474 = vmatprep.subr.bf16.mxu0 %v528_v0  ;;  %504 = vmatprep.subr.bf16.mxu1 %v528_v0 }
  0x28   :  { %476 = vmatpush1.bf16.msra.mxu0 %v475_v32  ;;  %520 = vmatpush1.bf16.msra.mxu1 %v475_v32  ;;  %v72_v32 = vld [vmem:[%s1043_s0 + $0x1d0] sm:$0xff] }
  0x29   :  { %477 = vmatprep.subr.bf16.mxu0 %v528_v0  ;;  %505 = vmatprep.subr.bf16.mxu1 %v528_v0 }
  0x2c   :  { %479 = vmatpush1.bf16.msra.mxu0 %v478_v35  ;;  %521 = vmatpush1.bf16.msra.mxu1 %v478_v35  ;;  %v38_v35 = vld [vmem:[%s1043_s0 + $0xc0] sm:$0xff] }
  0x2d   :  { %480 = vmatprep.subr.bf16.mxu0 %v528_v0  ;;  %506 = vmatprep.subr.bf16.mxu1 %v528_v0 }
  0x30   :  { %482 = vmatpush1.bf16.msra.mxu0 %v481_v38  ;;  %522 = vmatpush1.bf16.msra.mxu1 %v481_v38  ;;  %v77_v38 = vld [vmem:[%s1043_s0 + $0x1f8] sm:$0xff] }
  0x31   :  { %483 = vmatprep.subr.bf16.mxu0 %v528_v0  ;;  %507 = vmatprep.subr.bf16.mxu1 %v528_v0 }
  0x34   :  { %485 = vmatpush1.bf16.msra.mxu0 %v484_v41  ;;  %523 = vmatpush1.bf16.msra.mxu1 %v484_v41  ;;  %v43_v41 = vld [vmem:[%s1043_s0 + $0xe8] sm:$0xff] }
  0x35   :  { %486 = vmatprep.subr.bf16.mxu0 %v528_v0  ;;  %508 = vmatprep.subr.bf16.mxu1 %v528_v0 }
  0x38   :  { %488 = vmatpush1.bf16.msra.mxu0 %v487_v44  ;;  %524 = vmatpush1.bf16.msra.mxu1 %v487_v44  ;;  %v78_v44 = vld [vmem:[%s1043_s0 + $0x200] sm:$0xff] }
  0x39   :  { %489 = vmatprep.subr.bf16.mxu0 %v528_v0  ;;  %509 = vmatprep.subr.bf16.mxu1 %v528_v0 }
  0x3c   :  { %491 = vmatpush1.bf16.msra.mxu0 %v490_v47  ;;  %525 = vmatpush1.bf16.msra.mxu1 %v490_v47  ;;  %v44_v47 = vld [vmem:[%s1043_s0 + $0xf0] sm:$0xff] }
  0x3d   :  { %492 = vmatprep.subr.bf16.mxu0 %v528_v0  ;;  %510 = vmatprep.subr.bf16.mxu1 %v528_v0  ;;  %v56_v0 = vld [vmem:[%s1043_s0 + $0x150] sm:$0xff] }
  0x40   :  { %494 = vmatpush1.bf16.msra.mxu0 %v493_v50  ;;  %526 = vmatpush1.bf16.msra.mxu1 %v493_v50  ;;  %v83_v50 = vld [vmem:[%s1043_s0 + $0x228] sm:$0xff] }
  0x43   :  { %190 = vmatmul.mubr.f32.vlgmr.msra.gmra.mrb[0].mxu0 %v14_v51  ;;  %280 = vmatmul.mubr.f32.vlgmr.msra.gmra.mrb[0].mxu1 %v50_v52  ;;  %v46_v51 = vld [vmem:[%s1043_s0 + $0x100] sm:$0xff] }
  0x44   :  { %194 = vmatprep.mubr.f32.mxu0 %v17_v53  ;;  %284 = vmatprep.mubr.f32.mxu1 %v53_v54  ;;  %v82_v52 = vld [vmem:[%s1043_s0 + $0x220] sm:$0xff]  ;;  %v49_v53 = vld [vmem:[%s1043_s0 + $0x118] sm:$0xff] }
  0x45   :  { %v85_v54 = vld [vmem:[%s1043_s0 + $0x238] sm:$0xff] }
  0x47   :  { %195 = vmatmul.mubr.f32.gmra.mrb[2].mxu0 %v16_v55  ;;  %285 = vmatmul.mubr.f32.gmra.mrb[2].mxu1 %v52_v56  ;;  %v48_v55 = vld [vmem:[%s1043_s0 + $0x110] sm:$0xff] }
  0x48   :  { %199 = vmatprep.mubr.f32.mxu0 %v19_v57  ;;  %289 = vmatprep.mubr.f32.mxu1 %v55_v58  ;;  %v84_v56 = vld [vmem:[%s1043_s0 + $0x230] sm:$0xff]  ;;  %v896_v57 = vld [vmem:[%s1044_s2] ss:$0 sm:$0xff] }
  0x4b   :  { %200 = vmatmul.mubr.f32.gmra.mrb[4].mxu0 %v18_v59  ;;  %290 = vmatmul.mubr.f32.gmra.mrb[4].mxu1 %v54_v60 }
  0x4c   :  { %204 = vmatprep.mubr.f32.mxu0 %v21_v61  ;;  %294 = vmatprep.mubr.f32.mxu1 %v57_v62 }
  0x4f   :  { %205 = vmatmul.mubr.f32.gmra.mrb[6].mxu0 %v20_v63  ;;  %295 = vmatmul.mubr.f32.gmra.mrb[6].mxu1 %v56_v0 }
  0x50   :  { %209 = vmatprep.mubr.f32.mxu0 %v23_v1  ;;  %299 = vmatprep.mubr.f32.mxu1 %v59_v2 }
  0x53   :  { %210 = vmatmul.mubr.f32.gmra.mrb[8].mxu0 %v22_v3  ;;  %300 = vmatmul.mubr.f32.gmra.mrb[8].mxu1 %v58_v4 }
  0x54   :  { %214 = vmatprep.mubr.f32.mxu0 %v25_v5  ;;  %304 = vmatprep.mubr.f32.mxu1 %v61_v6 }
  0x57   :  { %215 = vmatmul.mubr.f32.gmra.mrb[10].mxu0 %v24_v7  ;;  %305 = vmatmul.mubr.f32.gmra.mrb[10].mxu1 %v60_v8 }
  0x58   :  { %219 = vmatprep.mubr.f32.mxu0 %v27_v9  ;;  %309 = vmatprep.mubr.f32.mxu1 %v63_v10 }
  0x5b   :  { %220 = vmatmul.mubr.f32.gmra.mrb[12].mxu0 %v26_v11  ;;  %310 = vmatmul.mubr.f32.gmra.mrb[12].mxu1 %v62_v12 }
  0x5c   :  { %224 = vmatprep.mubr.f32.mxu0 %v29_v13  ;;  %314 = vmatprep.mubr.f32.mxu1 %v65_v14 }
  0x5f   :  { %225 = vmatmul.mubr.f32.gmra.mrb[14].mxu0 %v28_v15  ;;  %315 = vmatmul.mubr.f32.gmra.mrb[14].mxu1 %v64_v16 }
  0x60   :  { %229 = vmatprep.mubr.f32.mxu0 %v31_v17  ;;  %319 = vmatprep.mubr.f32.mxu1 %v67_v18 }
  0x63   :  { %230 = vmatmul.mubr.f32.gmra.mrb[16].mxu0 %v30_v19  ;;  %320 = vmatmul.mubr.f32.gmra.mrb[16].mxu1 %v66_v20 }
  0x64   :  { %234 = vmatprep.mubr.f32.mxu0 %v33_v21  ;;  %324 = vmatprep.mubr.f32.mxu1 %v69_v22 }
  0x67   :  { %235 = vmatmul.mubr.f32.gmra.mrb[18].mxu0 %v32_v23  ;;  %325 = vmatmul.mubr.f32.gmra.mrb[18].mxu1 %v68_v24 }
  0x68   :  { %239 = vmatprep.mubr.f32.mxu0 %v35_v25  ;;  %329 = vmatprep.mubr.f32.mxu1 %v71_v26 }
  0x6b   :  { %240 = vmatmul.mubr.f32.gmra.mrb[20].mxu0 %v34_v27  ;;  %330 = vmatmul.mubr.f32.gmra.mrb[20].mxu1 %v70_v28 }
  0x6c   :  { %244 = vmatprep.mubr.f32.mxu0 %v37_v29  ;;  %334 = vmatprep.mubr.f32.mxu1 %v73_v30 }
  0x6f   :  { %245 = vmatmul.mubr.f32.gmra.mrb[22].mxu0 %v36_v31  ;;  %335 = vmatmul.mubr.f32.gmra.mrb[22].mxu1 %v72_v32 }
  0x70   :  { %249 = vmatprep.mubr.f32.mxu0 %v39_v33  ;;  %339 = vmatprep.mubr.f32.mxu1 %v75_v34 }
  0x73   :  { %250 = vmatmul.mubr.f32.gmra.mrb[24].mxu0 %v38_v35  ;;  %340 = vmatmul.mubr.f32.gmra.mrb[24].mxu1 %v74_v36 }
  0x74   :  { %254 = vmatprep.mubr.f32.mxu0 %v41_v37  ;;  %344 = vmatprep.mubr.f32.mxu1 %v77_v38 }
  0x77   :  { %255 = vmatmul.mubr.f32.gmra.mrb[26].mxu0 %v40_v39  ;;  %345 = vmatmul.mubr.f32.gmra.mrb[26].mxu1 %v76_v40 }
  0x78   :  { %259 = vmatprep.mubr.f32.mxu0 %v43_v41  ;;  %349 = vmatprep.mubr.f32.mxu1 %v79_v42 }
  0x7b   :  { %260 = vmatmul.mubr.f32.gmra.mrb[28].mxu0 %v42_v43  ;;  %350 = vmatmul.mubr.f32.gmra.mrb[28].mxu1 %v78_v44 }
  0x7c   :  { %264 = vmatprep.mubr.f32.mxu0 %v45_v45  ;;  %354 = vmatprep.mubr.f32.mxu1 %v81_v46 }
  0x7f   :  { %265 = vmatmul.mubr.f32.gmra.mrb[30].mxu0 %v44_v47  ;;  %355 = vmatmul.mubr.f32.gmra.mrb[30].mxu1 %v80_v48 }
  0x80   :  { %269 = vmatprep.mubr.f32.mxu0 %v47_v49  ;;  %359 = vmatprep.mubr.f32.mxu1 %v83_v50 }
  0x83   :  { %270 = vmatmul.mubr.f32.gmra.mrb[32].mxu0 %v46_v51  ;;  %360 = vmatmul.mubr.f32.gmra.mrb[32].mxu1 %v82_v52 }
  0x84   :  { %274 = vmatprep.mubr.f32.mxu0 %v49_v53  ;;  %364 = vmatprep.mubr.f32.mxu1 %v85_v54 }
  0x87   :  { %275 = vmatmul.mubr.f32.gmra.mrb[34].mxu0 %v48_v55  ;;  %365 = vmatmul.mubr.f32.gmra.mrb[34].mxu1 %v84_v56 }
 0x116   :  { %v191_v58 = vpop.f32.mrb[0].mxu0  ;;  %v281_v59 = vpop.f32.mrb[0].mxu1 }
 0x117   :  { %v192_v60 = vadd.f32 %v896_v57, %v191_v58  ;;  %v282_v61 = vadd.f32 %v896_v57, %v281_v59  ;;  %v193_v62 = vpop.f32.mrb[1].mxu0  ;;  %v283_v63 = vpop.f32.mrb[1].mxu1 }
 0x119   :  { %v370_v0 = vmax.f32 %v192_v60, 0.0  ;;  %v388_v1 = vmax.f32 %v282_v61, 0.0 }
 0x11a   :  { %v196_v2 = vpop.f32.mrb[2].mxu0  ;;  %v286_v3 = vpop.f32.mrb[2].mxu1 }
 0x11b   :  { %406 = vst [vmem:[%s1045_s3] sm:$0xff] %v370_v0  ;;  %424 = vst [vmem:[%s1045_s3 + $0x90] sm:$0xff] %v388_v1  ;;  %v197_v4 = vadd.f32 %v896_v57, %v196_v2  ;;  %v287_v5 = vadd.f32 %v896_v57, %v286_v3  ;;  %v198_v6 = vpop.f32.mrb[3].mxu0  ;;  %v288_v7 = vpop.f32.mrb[3].mxu1 }
 0x11d   :  { %v371_v8 = vmax.f32 %v197_v4, 0.0  ;;  %v389_v9 = vmax.f32 %v287_v5, 0.0 }
 0x11e   :  { %v201_v10 = vpop.f32.mrb[4].mxu0  ;;  %v291_v11 = vpop.f32.mrb[4].mxu1 }
 0x11f   :  { %407 = vst [vmem:[%s1045_s3 + $0x8] sm:$0xff] %v371_v8  ;;  %425 = vst [vmem:[%s1045_s3 + $0x98] sm:$0xff] %v389_v9  ;;  %v202_v12 = vadd.f32 %v896_v57, %v201_v10  ;;  %v292_v13 = vadd.f32 %v896_v57, %v291_v11  ;;  %v203_v14 = vpop.f32.mrb[5].mxu0  ;;  %v293_v15 = vpop.f32.mrb[5].mxu1 }
 0x121   :  { %v372_v16 = vmax.f32 %v202_v12, 0.0  ;;  %v390_v17 = vmax.f32 %v292_v13, 0.0 }
 0x122   :  { %v206_v18 = vpop.f32.mrb[6].mxu0  ;;  %v296_v19 = vpop.f32.mrb[6].mxu1 }
 0x123   :  { %408 = vst [vmem:[%s1045_s3 + $0x10] sm:$0xff] %v372_v16  ;;  %426 = vst [vmem:[%s1045_s3 + $0xa0] sm:$0xff] %v390_v17  ;;  %v207_v20 = vadd.f32 %v896_v57, %v206_v18  ;;  %v297_v21 = vadd.f32 %v896_v57, %v296_v19  ;;  %v208_v22 = vpop.f32.mrb[7].mxu0  ;;  %v298_v23 = vpop.f32.mrb[7].mxu1 }
 0x125   :  { %v373_v24 = vmax.f32 %v207_v20, 0.0  ;;  %v391_v25 = vmax.f32 %v297_v21, 0.0 }
 0x126   :  { %v211_v26 = vpop.f32.mrb[8].mxu0  ;;  %v301_v27 = vpop.f32.mrb[8].mxu1 }
 0x127   :  { %409 = vst [vmem:[%s1045_s3 + $0x18] sm:$0xff] %v373_v24  ;;  %427 = vst [vmem:[%s1045_s3 + $0xa8] sm:$0xff] %v391_v25  ;;  %v212_v28 = vadd.f32 %v896_v57, %v211_v26  ;;  %v302_v29 = vadd.f32 %v896_v57, %v301_v27  ;;  %v213_v30 = vpop.f32.mrb[9].mxu0  ;;  %v303_v31 = vpop.f32.mrb[9].mxu1 }
 0x129   :  { %v374_v32 = vmax.f32 %v212_v28, 0.0  ;;  %v392_v33 = vmax.f32 %v302_v29, 0.0 }
 0x12a   :  { %v216_v34 = vpop.f32.mrb[10].mxu0  ;;  %v306_v35 = vpop.f32.mrb[10].mxu1 }
 0x12b   :  { %410 = vst [vmem:[%s1045_s3 + $0x20] sm:$0xff] %v374_v32  ;;  %428 = vst [vmem:[%s1045_s3 + $0xb0] sm:$0xff] %v392_v33  ;;  %v217_v36 = vadd.f32 %v896_v57, %v216_v34  ;;  %v307_v37 = vadd.f32 %v896_v57, %v306_v35  ;;  %v218_v38 = vpop.f32.mrb[11].mxu0  ;;  %v308_v39 = vpop.f32.mrb[11].mxu1 }
 0x12d   :  { %v375_v40 = vmax.f32 %v217_v36, 0.0  ;;  %v393_v41 = vmax.f32 %v307_v37, 0.0 }
 0x12e   :  { %v221_v42 = vpop.f32.mrb[12].mxu0  ;;  %v311_v43 = vpop.f32.mrb[12].mxu1 }
 0x12f   :  { %411 = vst [vmem:[%s1045_s3 + $0x28] sm:$0xff] %v375_v40  ;;  %429 = vst [vmem:[%s1045_s3 + $0xb8] sm:$0xff] %v393_v41  ;;  %v222_v44 = vadd.f32 %v896_v57, %v221_v42  ;;  %v312_v45 = vadd.f32 %v896_v57, %v311_v43  ;;  %v223_v46 = vpop.f32.mrb[13].mxu0  ;;  %v313_v47 = vpop.f32.mrb[13].mxu1 }
 0x131   :  { %v376_v48 = vmax.f32 %v222_v44, 0.0  ;;  %v394_v49 = vmax.f32 %v312_v45, 0.0 }
 0x132   :  { %v226_v50 = vpop.f32.mrb[14].mxu0  ;;  %v316_v51 = vpop.f32.mrb[14].mxu1 }
 0x133   :  { %412 = vst [vmem:[%s1045_s3 + $0x30] sm:$0xff] %v376_v48  ;;  %430 = vst [vmem:[%s1045_s3 + $0xc0] sm:$0xff] %v394_v49  ;;  %v227_v52 = vadd.f32 %v896_v57, %v226_v50  ;;  %v317_v53 = vadd.f32 %v896_v57, %v316_v51  ;;  %v228_v54 = vpop.f32.mrb[15].mxu0  ;;  %v318_v55 = vpop.f32.mrb[15].mxu1 }
 0x135   :  { %v377_v56 = vmax.f32 %v227_v52, 0.0  ;;  %v395_v58 = vmax.f32 %v317_v53, 0.0 }
 0x136   :  { %v231_v59 = vpop.f32.mrb[16].mxu0  ;;  %v321_v60 = vpop.f32.mrb[16].mxu1 }
 0x137   :  { %413 = vst [vmem:[%s1045_s3 + $0x38] sm:$0xff] %v377_v56  ;;  %431 = vst [vmem:[%s1045_s3 + $0xc8] sm:$0xff] %v395_v58  ;;  %v232_v61 = vadd.f32 %v896_v57, %v231_v59  ;;  %v322_v62 = vadd.f32 %v896_v57, %v321_v60  ;;  %v233_v63 = vpop.f32.mrb[17].mxu0  ;;  %v323_v0 = vpop.f32.mrb[17].mxu1 }
 0x139   :  { %v378_v1 = vmax.f32 %v232_v61, 0.0  ;;  %v396_v2 = vmax.f32 %v322_v62, 0.0 }
 0x13a   :  { %v236_v3 = vpop.f32.mrb[18].mxu0  ;;  %v326_v4 = vpop.f32.mrb[18].mxu1 }
 0x13b   :  { %414 = vst [vmem:[%s1045_s3 + $0x40] sm:$0xff] %v378_v1  ;;  %432 = vst [vmem:[%s1045_s3 + $0xd0] sm:$0xff] %v396_v2  ;;  %v237_v5 = vadd.f32 %v896_v57, %v236_v3  ;;  %v327_v6 = vadd.f32 %v896_v57, %v326_v4  ;;  %v238_v7 = vpop.f32.mrb[19].mxu0  ;;  %v328_v8 = vpop.f32.mrb[19].mxu1 }
 0x13d   :  { %v379_v9 = vmax.f32 %v237_v5, 0.0  ;;  %v397_v10 = vmax.f32 %v327_v6, 0.0 }
 0x13e   :  { %v241_v11 = vpop.f32.mrb[20].mxu0  ;;  %v331_v12 = vpop.f32.mrb[20].mxu1 }
 0x13f   :  { %415 = vst [vmem:[%s1045_s3 + $0x48] sm:$0xff] %v379_v9  ;;  %433 = vst [vmem:[%s1045_s3 + $0xd8] sm:$0xff] %v397_v10  ;;  %v242_v13 = vadd.f32 %v896_v57, %v241_v11  ;;  %v332_v14 = vadd.f32 %v896_v57, %v331_v12  ;;  %v243_v15 = vpop.f32.mrb[21].mxu0  ;;  %v333_v16 = vpop.f32.mrb[21].mxu1 }
 0x141   :  { %v380_v17 = vmax.f32 %v242_v13, 0.0  ;;  %v398_v18 = vmax.f32 %v332_v14, 0.0 }
 0x142   :  { %v246_v19 = vpop.f32.mrb[22].mxu0  ;;  %v336_v20 = vpop.f32.mrb[22].mxu1 }
 0x143   :  { %416 = vst [vmem:[%s1045_s3 + $0x50] sm:$0xff] %v380_v17  ;;  %434 = vst [vmem:[%s1045_s3 + $0xe0] sm:$0xff] %v398_v18  ;;  %v247_v21 = vadd.f32 %v896_v57, %v246_v19  ;;  %v337_v22 = vadd.f32 %v896_v57, %v336_v20  ;;  %v248_v23 = vpop.f32.mrb[23].mxu0  ;;  %v338_v24 = vpop.f32.mrb[23].mxu1 }
 0x145   :  { %v381_v25 = vmax.f32 %v247_v21, 0.0  ;;  %v399_v26 = vmax.f32 %v337_v22, 0.0 }
 0x146   :  { %v251_v27 = vpop.f32.mrb[24].mxu0  ;;  %v341_v28 = vpop.f32.mrb[24].mxu1 }
 0x147   :  { %417 = vst [vmem:[%s1045_s3 + $0x58] sm:$0xff] %v381_v25  ;;  %435 = vst [vmem:[%s1045_s3 + $0xe8] sm:$0xff] %v399_v26  ;;  %v252_v29 = vadd.f32 %v896_v57, %v251_v27  ;;  %v342_v30 = vadd.f32 %v896_v57, %v341_v28  ;;  %v253_v31 = vpop.f32.mrb[25].mxu0  ;;  %v343_v32 = vpop.f32.mrb[25].mxu1 }
 0x149   :  { %v382_v33 = vmax.f32 %v252_v29, 0.0  ;;  %v400_v34 = vmax.f32 %v342_v30, 0.0 }
 0x14a   :  { %v256_v35 = vpop.f32.mrb[26].mxu0  ;;  %v346_v36 = vpop.f32.mrb[26].mxu1 }
 0x14b   :  { %418 = vst [vmem:[%s1045_s3 + $0x60] sm:$0xff] %v382_v33  ;;  %436 = vst [vmem:[%s1045_s3 + $0xf0] sm:$0xff] %v400_v34  ;;  %v257_v37 = vadd.f32 %v896_v57, %v256_v35  ;;  %v347_v38 = vadd.f32 %v896_v57, %v346_v36  ;;  %v258_v39 = vpop.f32.mrb[27].mxu0  ;;  %v348_v40 = vpop.f32.mrb[27].mxu1 }
 0x14d   :  { %v383_v41 = vmax.f32 %v257_v37, 0.0  ;;  %v401_v42 = vmax.f32 %v347_v38, 0.0 }
 0x14e   :  { %v261_v43 = vpop.f32.mrb[28].mxu0  ;;  %v351_v44 = vpop.f32.mrb[28].mxu1 }
 0x14f   :  { %419 = vst [vmem:[%s1045_s3 + $0x68] sm:$0xff] %v383_v41  ;;  %437 = vst [vmem:[%s1045_s3 + $0xf8] sm:$0xff] %v401_v42  ;;  %v262_v45 = vadd.f32 %v896_v57, %v261_v43  ;;  %v352_v46 = vadd.f32 %v896_v57, %v351_v44  ;;  %v263_v47 = vpop.f32.mrb[29].mxu0  ;;  %v353_v48 = vpop.f32.mrb[29].mxu1 }
 0x151   :  { %v384_v49 = vmax.f32 %v262_v45, 0.0  ;;  %v402_v50 = vmax.f32 %v352_v46, 0.0 }
 0x152   :  { %v266_v51 = vpop.f32.mrb[30].mxu0  ;;  %v356_v52 = vpop.f32.mrb[30].mxu1 }
 0x153   :  { %420 = vst [vmem:[%s1045_s3 + $0x70] sm:$0xff] %v384_v49  ;;  %438 = vst [vmem:[%s1045_s3 + $0x100] sm:$0xff] %v402_v50  ;;  %v267_v53 = vadd.f32 %v896_v57, %v266_v51  ;;  %v357_v54 = vadd.f32 %v896_v57, %v356_v52  ;;  %v268_v55 = vpop.f32.mrb[31].mxu0  ;;  %v358_v56 = vpop.f32.mrb[31].mxu1 }
 0x155   :  { %v385_v58 = vmax.f32 %v267_v53, 0.0  ;;  %v403_v59 = vmax.f32 %v357_v54, 0.0 }
 0x156   :  { %v271_v60 = vpop.f32.mrb[32].mxu0  ;;  %v361_v61 = vpop.f32.mrb[32].mxu1 }
 0x157   :  { %421 = vst [vmem:[%s1045_s3 + $0x78] sm:$0xff] %v385_v58  ;;  %439 = vst [vmem:[%s1045_s3 + $0x108] sm:$0xff] %v403_v59  ;;  %v272_v62 = vadd.f32 %v896_v57, %v271_v60  ;;  %v362_v63 = vadd.f32 %v896_v57, %v361_v61  ;;  %v273_v0 = vpop.f32.mrb[33].mxu0  ;;  %v363_v1 = vpop.f32.mrb[33].mxu1 }
 0x159   :  { %v386_v2 = vmax.f32 %v272_v62, 0.0  ;;  %v404_v3 = vmax.f32 %v362_v63, 0.0 }
 0x15a   :  { %v276_v4 = vpop.f32.mrb[34].mxu0  ;;  %v366_v5 = vpop.f32.mrb[34].mxu1 }
 0x15b   :  { %422 = vst [vmem:[%s1045_s3 + $0x80] sm:$0xff] %v386_v2  ;;  %440 = vst [vmem:[%s1045_s3 + $0x110] sm:$0xff] %v404_v3  ;;  %v277_v6 = vadd.f32 %v896_v57, %v276_v4  ;;  %v367_v7 = vadd.f32 %v896_v57, %v366_v5  ;;  %v278_v8 = vpop.f32.mrb[35].mxu0  ;;  %v368_v9 = vpop.f32.mrb[35].mxu1 }
 0x15d   :  { %v387_v10 = vmax.f32 %v277_v6, 0.0  ;;  %v405_v11 = vmax.f32 %v367_v7, 0.0 }
 0x15f   :  { %423 = vst [vmem:[%s1045_s3 + $0x88] sm:$0xff] %v387_v10  ;;  %441 = vst [vmem:[%s1045_s3 + $0x118] sm:$0xff] %v405_v11 }

// kernel: dqn_forward.5
= control target key start
LH: loop header
LB: loop body
LE: loop exit
PB: predicated region body
PF: predicated region fallthrough
CT: control target
= control target key end

     0   :  { %s831_s1 = inlined_call_operand.vmem [shape: f32[512,128], index: 1, kind: input, shape index: {}]   ;;  %s832_s0 = inlined_call_operand.vmem [shape: f32[56,512], index: 0, kind: input, shape index: {}]   ;;  %s833_s2 = inlined_call_operand.vmem [shape: f32[1,128], index: 2, kind: input, shape index: {}]   ;;  %s834_s3 = inlined_call_operand.vmem [shape: f32[56,128], index: 3, kind: output, shape index: {}]  }
   0x1   :  { %v58_v0 = vld [vmem:[%s831_s1 + $0x80] sm:$0xff]  ;;  %v59_v1 = vld [vmem:[%s831_s1 + $0x88] sm:$0xff]  ;;  %v60_v11 = vld [vmem:[%s831_s1 + $0x90] sm:$0xff] }
   0x2   :  { %v42_v2 = vld [vmem:[%s831_s1] sm:$0xff]  ;;  %v438_v3 = vpack.c.bf16 %v59_v1, %v58_v0  ;;  %v43_v4 = vld [vmem:[%s831_s1 + $0x8] sm:$0xff]  ;;  %v61_v13 = vld [vmem:[%s831_s1 + $0x98] sm:$0xff] }
   0x3   :  { %v90_v5 = vld [vmem:[%s831_s1 + $0x180] sm:$0xff]  ;;  %v91_v6 = vld [vmem:[%s831_s1 + $0x188] sm:$0xff]  ;;  %v440_v7 = vpack.c.bf16 %v43_v4, %v42_v2  ;;  %v44_v14 = vld [vmem:[%s831_s1 + $0x10] sm:$0xff]  ;;  %v442_v16 = vpack.c.bf16 %v61_v13, %v60_v11 }
   0x4   :  { %v470_v8 = vpack.c.bf16 %v91_v6, %v90_v5  ;;  %v74_v9 = vld [vmem:[%s831_s1 + $0x100] sm:$0xff]  ;;  %v75_v10 = vld [vmem:[%s831_s1 + $0x108] sm:$0xff]  ;;  %439 = vmatprep.subr.bf16.mxu0 %v438_v3  ;;  %v45_v15 = vld [vmem:[%s831_s1 + $0x18] sm:$0xff] }
   0x5   :  { %v472_v12 = vpack.c.bf16 %v75_v10, %v74_v9  ;;  %441 = vmatpush3.bf16.msra.mxu0 %v440_v7  ;;  %v444_v17 = vpack.c.bf16 %v45_v15, %v44_v14  ;;  %v92_v18 = vld [vmem:[%s831_s1 + $0x190] sm:$0xff]  ;;  %v93_v19 = vld [vmem:[%s831_s1 + $0x198] sm:$0xff]  ;;  %v62_v23 = vld [vmem:[%s831_s1 + $0xa0] sm:$0xff] }
   0x6   :  { %471 = vmatprep.subr.bf16.mxu1 %v470_v8  ;;  %v76_v20 = vld [vmem:[%s831_s1 + $0x110] sm:$0xff]  ;;  %v474_v21 = vpack.c.bf16 %v93_v19, %v92_v18  ;;  %v77_v22 = vld [vmem:[%s831_s1 + $0x118] sm:$0xff]  ;;  %v63_v24 = vld [vmem:[%s831_s1 + $0xa8] sm:$0xff]  ;;  %443 = vmatprep.subr.bf16.mxu0 %v442_v16 }
   0x7   :  { %473 = vmatpush3.bf16.msra.mxu1 %v472_v12  ;;  %v476_v25 = vpack.c.bf16 %v77_v22, %v76_v20  ;;  %v446_v26 = vpack.c.bf16 %v63_v24, %v62_v23  ;;  %v46_v27 = vld [vmem:[%s831_s1 + $0x20] sm:$0xff]  ;;  %v47_v28 = vld [vmem:[%s831_s1 + $0x28] sm:$0xff]  ;;  %v64_v35 = vld [vmem:[%s831_s1 + $0xb0] sm:$0xff] }
   0x8   :  { %v94_v29 = vld [vmem:[%s831_s1 + $0x1a0] sm:$0xff]  ;;  %475 = vmatprep.subr.bf16.mxu1 %v474_v21  ;;  %v95_v30 = vld [vmem:[%s831_s1 + $0x1a8] sm:$0xff]  ;;  %v448_v33 = vpack.c.bf16 %v47_v28, %v46_v27  ;;  %v65_v36 = vld [vmem:[%s831_s1 + $0xb8] sm:$0xff] }
   0x9   :  { %v78_v31 = vld [vmem:[%s831_s1 + $0x120] sm:$0xff]  ;;  %v79_v32 = vld [vmem:[%s831_s1 + $0x128] sm:$0xff]  ;;  %445 = vmatpush3.bf16.msra.mxu0 %v444_v17  ;;  %v478_v34 = vpack.c.bf16 %v95_v30, %v94_v29  ;;  %v48_v37 = vld [vmem:[%s831_s1 + $0x30] sm:$0xff]  ;;  %v450_v39 = vpack.c.bf16 %v65_v36, %v64_v35 }
   0xa   :  { %447 = vmatprep.subr.bf16.mxu0 %v446_v26  ;;  %v480_v38 = vpack.c.bf16 %v79_v32, %v78_v31  ;;  %v49_v40 = vld [vmem:[%s831_s1 + $0x38] sm:$0xff]  ;;  %v96_v41 = vld [vmem:[%s831_s1 + $0x1b0] sm:$0xff]  ;;  %v66_v46 = vld [vmem:[%s831_s1 + $0xc0] sm:$0xff] }
   0xb   :  { %477 = vmatpush3.bf16.msra.mxu1 %v476_v25  ;;  %v97_v42 = vld [vmem:[%s831_s1 + $0x1b8] sm:$0xff]  ;;  %v80_v44 = vld [vmem:[%s831_s1 + $0x130] sm:$0xff]  ;;  %v67_v47 = vld [vmem:[%s831_s1 + $0xc8] sm:$0xff]  ;;  %v452_v48 = vpack.c.bf16 %v49_v40, %v48_v37 }
   0xc   :  { %479 = vmatprep.subr.bf16.mxu1 %v478_v34  ;;  %v482_v43 = vpack.c.bf16 %v97_v42, %v96_v41  ;;  %v81_v45 = vld [vmem:[%s831_s1 + $0x138] sm:$0xff]  ;;  %v98_v49 = vld [vmem:[%s831_s1 + $0x1c0] sm:$0xff]  ;;  %v99_v50 = vld [vmem:[%s831_s1 + $0x1c8] sm:$0xff]  ;;  %v454_v52 = vpack.c.bf16 %v67_v47, %v66_v46 }
   0xd   :  { %449 = vmatpush3.bf16.msra.mxu0 %v448_v33  ;;  %v484_v51 = vpack.c.bf16 %v81_v45, %v80_v44  ;;  %v50_v53 = vld [vmem:[%s831_s1 + $0x40] sm:$0xff]  ;;  %v51_v54 = vld [vmem:[%s831_s1 + $0x48] sm:$0xff]  ;;  %v486_v56 = vpack.c.bf16 %v99_v50, %v98_v49  ;;  %v68_v58 = vld [vmem:[%s831_s1 + $0xd0] sm:$0xff] }
   0xe   :  { %451 = vmatprep.subr.bf16.mxu0 %v450_v39  ;;  %v82_v55 = vld [vmem:[%s831_s1 + $0x140] sm:$0xff]  ;;  %v83_v57 = vld [vmem:[%s831_s1 + $0x148] sm:$0xff]  ;;  %v69_v59 = vld [vmem:[%s831_s1 + $0xd8] sm:$0xff]  ;;  %v456_v62 = vpack.c.bf16 %v51_v54, %v50_v53 }
   0xf   :  { %481 = vmatpush3.bf16.msra.mxu1 %v480_v38  ;;  %v100_v60 = vld [vmem:[%s831_s1 + $0x1d0] sm:$0xff]  ;;  %v101_v61 = vld [vmem:[%s831_s1 + $0x1d8] sm:$0xff]  ;;  %v488_v63 = vpack.c.bf16 %v83_v57, %v82_v55  ;;  %v458_v0 = vpack.c.bf16 %v69_v59, %v68_v58  ;;  %v70_v6 = vld [vmem:[%s831_s1 + $0xe0] sm:$0xff] }
  0x10   :  { %483 = vmatprep.subr.bf16.mxu1 %v482_v43  ;;  %v52_v1 = vld [vmem:[%s831_s1 + $0x50] sm:$0xff]  ;;  %v53_v2 = vld [vmem:[%s831_s1 + $0x58] sm:$0xff]  ;;  %v490_v4 = vpack.c.bf16 %v101_v61, %v100_v60  ;;  %v71_v7 = vld [vmem:[%s831_s1 + $0xe8] sm:$0xff] }
  0x11   :  { %453 = vmatpush3.bf16.msra.mxu0 %v452_v48  ;;  %v84_v3 = vld [vmem:[%s831_s1 + $0x150] sm:$0xff]  ;;  %v85_v5 = vld [vmem:[%s831_s1 + $0x158] sm:$0xff]  ;;  %v102_v8 = vld [vmem:[%s831_s1 + $0x1e0] sm:$0xff]  ;;  %v460_v10 = vpack.c.bf16 %v53_v2, %v52_v1  ;;  %v462_v14 = vpack.c.bf16 %v71_v7, %v70_v6 }
  0x12   :  { %455 = vmatprep.subr.bf16.mxu0 %v454_v52  ;;  %v103_v9 = vld [vmem:[%s831_s1 + $0x1e8] sm:$0xff]  ;;  %v54_v11 = vld [vmem:[%s831_s1 + $0x60] sm:$0xff]  ;;  %v492_v13 = vpack.c.bf16 %v85_v5, %v84_v3  ;;  %v72_v19 = vld [vmem:[%s831_s1 + $0xf0] sm:$0xff] }
  0x13   :  { %485 = vmatpush3.bf16.msra.mxu1 %v484_v51  ;;  %v55_v12 = vld [vmem:[%s831_s1 + $0x68] sm:$0xff]  ;;  %v86_v15 = vld [vmem:[%s831_s1 + $0x160] sm:$0xff]  ;;  %v494_v18 = vpack.c.bf16 %v103_v9, %v102_v8  ;;  %v73_v20 = vld [vmem:[%s831_s1 + $0xf8] sm:$0xff] }
  0x14   :  { %487 = vmatprep.subr.bf16.mxu1 %v486_v56  ;;  %v87_v16 = vld [vmem:[%s831_s1 + $0x168] sm:$0xff]  ;;  %v17_v21 = vld [vmem:[%s832_s0 + $0x18] sm:$0xff]  ;;  %v104_v22 = vld [vmem:[%s831_s1 + $0x1f0] sm:$0xff]  ;;  %v464_v24 = vpack.c.bf16 %v55_v12, %v54_v11  ;;  %v466_v26 = vpack.c.bf16 %v73_v20, %v72_v19 }
  0x15   :  { %457 = vmatpush3.bf16.msra.mxu0 %v456_v62  ;;  %v15_v17 = vld [vmem:[%s832_s0 + $0x8] sm:$0xff]  ;;  %v105_v23 = vld [vmem:[%s831_s1 + $0x1f8] sm:$0xff]  ;;  %277 = vmatprep.mubr.f32.mxu1 %v17_v21  ;;  %v496_v25 = vpack.c.bf16 %v87_v16, %v86_v15  ;;  %v56_v27 = vld [vmem:[%s831_s1 + $0x70] sm:$0xff] }
  0x16   :  { %459 = vmatprep.subr.bf16.mxu0 %v458_v0  ;;  %177 = vmatprep.mubr.f32.mxu0 %v15_v17  ;;  %v57_v28 = vld [vmem:[%s831_s1 + $0x78] sm:$0xff]  ;;  %v498_v29 = vpack.c.bf16 %v105_v23, %v104_v22  ;;  %v88_v30 = vld [vmem:[%s831_s1 + $0x170] sm:$0xff]  ;;  %v14_v34 = vld [vmem:[%s832_s0] sm:$0xff] }
  0x17   :  { %489 = vmatpush3.bf16.msra.mxu1 %v488_v63  ;;  %v89_v31 = vld [vmem:[%s831_s1 + $0x178] sm:$0xff]  ;;  %v468_v32 = vpack.c.bf16 %v57_v28, %v56_v27  ;;  %v16_v35 = vld [vmem:[%s832_s0 + $0x10] sm:$0xff]  ;;  %v19_v36 = vld [vmem:[%s832_s0 + $0x28] sm:$0xff] }
  0x18   :  { %491 = vmatprep.subr.bf16.mxu1 %v490_v4  ;;  %v500_v33 = vpack.c.bf16 %v89_v31, %v88_v30  ;;  %v21_v37 = vld [vmem:[%s832_s0 + $0x38] sm:$0xff]  ;;  %v18_v38 = vld [vmem:[%s832_s0 + $0x20] sm:$0xff]  ;;  %v20_v39 = vld [vmem:[%s832_s0 + $0x30] sm:$0xff] }
  0x19   :  { %461 = vmatpush3.bf16.msra.mxu0 %v460_v10  ;;  %v23_v40 = vld [vmem:[%s832_s0 + $0x48] sm:$0xff]  ;;  %v25_v41 = vld [vmem:[%s832_s0 + $0x58] sm:$0xff]  ;;  %v22_v42 = vld [vmem:[%s832_s0 + $0x40] sm:$0xff] }
  0x1a   :  { %463 = vmatprep.subr.bf16.mxu0 %v462_v14  ;;  %v24_v43 = vld [vmem:[%s832_s0 + $0x50] sm:$0xff]  ;;  %v27_v44 = vld [vmem:[%s832_s0 + $0x68] sm:$0xff]  ;;  %v29_v45 = vld [vmem:[%s832_s0 + $0x78] sm:$0xff] }
  0x1b   :  { %493 = vmatpush3.bf16.msra.mxu1 %v492_v13  ;;  %v26_v46 = vld [vmem:[%s832_s0 + $0x60] sm:$0xff]  ;;  %v28_v47 = vld [vmem:[%s832_s0 + $0x70] sm:$0xff]  ;;  %v31_v48 = vld [vmem:[%s832_s0 + $0x88] sm:$0xff] }
  0x1c   :  { %495 = vmatprep.subr.bf16.mxu1 %v494_v18  ;;  %v33_v49 = vld [vmem:[%s832_s0 + $0x98] sm:$0xff]  ;;  %v30_v50 = vld [vmem:[%s832_s0 + $0x80] sm:$0xff]  ;;  %v32_v51 = vld [vmem:[%s832_s0 + $0x90] sm:$0xff] }
  0x1d   :  { %465 = vmatpush3.bf16.msra.mxu0 %v464_v24  ;;  %v35_v52 = vld [vmem:[%s832_s0 + $0xa8] sm:$0xff]  ;;  %v37_v53 = vld [vmem:[%s832_s0 + $0xb8] sm:$0xff]  ;;  %v34_v54 = vld [vmem:[%s832_s0 + $0xa0] sm:$0xff] }
  0x1e   :  { %467 = vmatprep.subr.bf16.mxu0 %v466_v26  ;;  %v36_v55 = vld [vmem:[%s832_s0 + $0xb0] sm:$0xff]  ;;  %v39_v56 = vld [vmem:[%s832_s0 + $0xc8] sm:$0xff]  ;;  %v41_v57 = vld [vmem:[%s832_s0 + $0xd8] sm:$0xff] }
  0x1f   :  { %497 = vmatpush3.bf16.msra.mxu1 %v496_v25  ;;  %v38_v58 = vld [vmem:[%s832_s0 + $0xc0] sm:$0xff]  ;;  %v40_v59 = vld [vmem:[%s832_s0 + $0xd0] sm:$0xff] }
  0x20   :  { %499 = vmatprep.subr.bf16.mxu1 %v498_v29  ;;  %v801_v61 = vld [vmem:[%s833_s2] ss:$0 sm:$0xff] }
  0x21   :  { %469 = vmatpush3.bf16.msra.mxu0 %v468_v32 }
  0x23   :  { %501 = vmatpush3.bf16.msra.mxu1 %v500_v33 }
  0x24   :  { %178 = vmatmul.mubr.f32.vlgmr.msra.gmra.mrb[0].mxu0 %v14_v34 }
  0x25   :  { %182 = vmatprep.mubr.f32.mxu0 %v19_v36 }
  0x26   :  { %278 = vmatmul.mubr.f32.vlgmr.msra.gmra.mrb[0].mxu1 %v16_v35 }
  0x27   :  { %282 = vmatprep.mubr.f32.mxu1 %v21_v37 }
  0x28   :  { %183 = vmatmul.mubr.f32.gmra.mrb[2].mxu0 %v18_v38 }
  0x29   :  { %187 = vmatprep.mubr.f32.mxu0 %v23_v40 }
  0x2a   :  { %283 = vmatmul.mubr.f32.gmra.mrb[2].mxu1 %v20_v39 }
  0x2b   :  { %287 = vmatprep.mubr.f32.mxu1 %v25_v41 }
  0x2c   :  { %188 = vmatmul.mubr.f32.gmra.mrb[4].mxu0 %v22_v42 }
  0x2d   :  { %192 = vmatprep.mubr.f32.mxu0 %v27_v44 }
  0x2e   :  { %288 = vmatmul.mubr.f32.gmra.mrb[4].mxu1 %v24_v43 }
  0x2f   :  { %292 = vmatprep.mubr.f32.mxu1 %v29_v45 }
  0x30   :  { %193 = vmatmul.mubr.f32.gmra.mrb[6].mxu0 %v26_v46 }
  0x31   :  { %197 = vmatprep.mubr.f32.mxu0 %v31_v48 }
  0x32   :  { %293 = vmatmul.mubr.f32.gmra.mrb[6].mxu1 %v28_v47 }
  0x33   :  { %297 = vmatprep.mubr.f32.mxu1 %v33_v49 }
  0x34   :  { %198 = vmatmul.mubr.f32.gmra.mrb[8].mxu0 %v30_v50 }
  0x35   :  { %202 = vmatprep.mubr.f32.mxu0 %v35_v52 }
  0x36   :  { %298 = vmatmul.mubr.f32.gmra.mrb[8].mxu1 %v32_v51 }
  0x37   :  { %302 = vmatprep.mubr.f32.mxu1 %v37_v53 }
  0x38   :  { %203 = vmatmul.mubr.f32.gmra.mrb[10].mxu0 %v34_v54 }
  0x39   :  { %207 = vmatprep.mubr.f32.mxu0 %v39_v56 }
  0x3a   :  { %303 = vmatmul.mubr.f32.gmra.mrb[10].mxu1 %v36_v55 }
  0x3b   :  { %307 = vmatprep.mubr.f32.mxu1 %v41_v57 }
  0x3c   :  { %208 = vmatmul.mubr.f32.gmra.mrb[12].mxu0 %v38_v58 }
  0x3e   :  { %308 = vmatmul.mubr.f32.gmra.mrb[12].mxu1 %v40_v59 }
  0xf7   :  { %v364_v60 = vpop.f32.mrb[0].mxu0 }
  0xf8   :  { %v365_v62 = vpop.f32.mrb[1].mxu0 }
  0xf9   :  { %v417_v63 = vpop.f32.mrb[0].mxu1  ;;  %v366_v0 = vadd.f32 %v365_v62, %v364_v60 }
  0xfa   :  { %v418_v1 = vpop.f32.mrb[1].mxu1 }
  0xfb   :  { %v419_v2 = vadd.f32 %v418_v1, %v417_v63  ;;  %v180_v3 = vadd.f32 %v366_v0, %v801_v61  ;;  %v367_v4 = vpop.f32.mrb[2].mxu0 }
  0xfc   :  { %v368_v5 = vpop.f32.mrb[3].mxu0 }
  0xfd   :  { %v420_v6 = vpop.f32.mrb[2].mxu1  ;;  %v280_v7 = vadd.f32 %v419_v2, %v180_v3  ;;  %v369_v8 = vadd.f32 %v368_v5, %v367_v4 }
  0xfe   :  { %v421_v9 = vpop.f32.mrb[3].mxu1 }
  0xff   :  { %v422_v10 = vadd.f32 %v421_v9, %v420_v6  ;;  %v313_v11 = vmax.f32 %v280_v7, 0.0  ;;  %v185_v12 = vadd.f32 %v369_v8, %v801_v61  ;;  %v370_v13 = vpop.f32.mrb[4].mxu0 }
 0x100   :  { %v371_v14 = vpop.f32.mrb[5].mxu0 }
 0x101   :  { %v423_v15 = vpop.f32.mrb[4].mxu1  ;;  %320 = vst [vmem:[%s834_s3] sm:$0xff] %v313_v11  ;;  %v285_v16 = vadd.f32 %v422_v10, %v185_v12  ;;  %v372_v17 = vadd.f32 %v371_v14, %v370_v13 }
 0x102   :  { %v424_v18 = vpop.f32.mrb[5].mxu1 }
 0x103   :  { %v425_v19 = vadd.f32 %v424_v18, %v423_v15  ;;  %v314_v20 = vmax.f32 %v285_v16, 0.0  ;;  %v190_v21 = vadd.f32 %v372_v17, %v801_v61  ;;  %v373_v22 = vpop.f32.mrb[6].mxu0 }
 0x104   :  { %v374_v23 = vpop.f32.mrb[7].mxu0 }
 0x105   :  { %v426_v24 = vpop.f32.mrb[6].mxu1  ;;  %321 = vst [vmem:[%s834_s3 + $0x8] sm:$0xff] %v314_v20  ;;  %v290_v25 = vadd.f32 %v425_v19, %v190_v21  ;;  %v375_v26 = vadd.f32 %v374_v23, %v373_v22 }
 0x106   :  { %v427_v27 = vpop.f32.mrb[7].mxu1 }
 0x107   :  { %v428_v28 = vadd.f32 %v427_v27, %v426_v24  ;;  %v315_v29 = vmax.f32 %v290_v25, 0.0  ;;  %v195_v30 = vadd.f32 %v375_v26, %v801_v61  ;;  %v376_v31 = vpop.f32.mrb[8].mxu0 }
 0x108   :  { %v377_v32 = vpop.f32.mrb[9].mxu0 }
 0x109   :  { %v429_v33 = vpop.f32.mrb[8].mxu1  ;;  %322 = vst [vmem:[%s834_s3 + $0x10] sm:$0xff] %v315_v29  ;;  %v295_v34 = vadd.f32 %v428_v28, %v195_v30  ;;  %v378_v35 = vadd.f32 %v377_v32, %v376_v31 }
 0x10a   :  { %v430_v36 = vpop.f32.mrb[9].mxu1 }
 0x10b   :  { %v431_v37 = vadd.f32 %v430_v36, %v429_v33  ;;  %v316_v38 = vmax.f32 %v295_v34, 0.0  ;;  %v200_v39 = vadd.f32 %v378_v35, %v801_v61  ;;  %v379_v40 = vpop.f32.mrb[10].mxu0 }
 0x10c   :  { %v380_v41 = vpop.f32.mrb[11].mxu0 }
 0x10d   :  { %v432_v42 = vpop.f32.mrb[10].mxu1  ;;  %323 = vst [vmem:[%s834_s3 + $0x18] sm:$0xff] %v316_v38  ;;  %v300_v43 = vadd.f32 %v431_v37, %v200_v39  ;;  %v381_v44 = vadd.f32 %v380_v41, %v379_v40 }
 0x10e   :  { %v433_v45 = vpop.f32.mrb[11].mxu1 }
 0x10f   :  { %v434_v46 = vadd.f32 %v433_v45, %v432_v42  ;;  %v317_v47 = vmax.f32 %v300_v43, 0.0  ;;  %v205_v48 = vadd.f32 %v381_v44, %v801_v61  ;;  %v382_v49 = vpop.f32.mrb[12].mxu0 }
 0x110   :  { %v383_v50 = vpop.f32.mrb[13].mxu0 }
 0x111   :  { %v435_v51 = vpop.f32.mrb[12].mxu1  ;;  %324 = vst [vmem:[%s834_s3 + $0x20] sm:$0xff] %v317_v47  ;;  %v305_v52 = vadd.f32 %v434_v46, %v205_v48  ;;  %v384_v53 = vadd.f32 %v383_v50, %v382_v49 }
 0x112   :  { %v436_v54 = vpop.f32.mrb[13].mxu1 }
 0x113   :  { %v437_v55 = vadd.f32 %v436_v54, %v435_v51  ;;  %v318_v56 = vmax.f32 %v305_v52, 0.0  ;;  %v210_v57 = vadd.f32 %v384_v53, %v801_v61 }
 0x115   :  { %325 = vst [vmem:[%s834_s3 + $0x28] sm:$0xff] %v318_v56  ;;  %v310_v58 = vadd.f32 %v437_v55, %v210_v57 }
 0x117   :  { %v319_v59 = vmax.f32 %v310_v58, 0.0 }
 0x119   :  { %326 = vst [vmem:[%s834_s3 + $0x30] sm:$0xff] %v319_v59 }

// kernel: dqn_forward.6
= control target key start
LH: loop header
LB: loop body
LE: loop exit
PB: predicated region body
PF: predicated region fallthrough
CT: control target
= control target key end

     0   :  { %vm575_vm0 = vmmov 0   ;;  %vm108_vm1 = vcmask 523264   ;;  %s870_s1 = inlined_call_operand.vmem [shape: f32[576,128], index: 1, kind: input, shape index: {}]   ;;  %s871_s0 = inlined_call_operand.vmem [shape: f32[24,576], index: 0, kind: input, shape index: {}]   ;;  %s872_s2 = inlined_call_operand.vmem [shape: f32[1,128], index: 2, kind: input, shape index: {}]   ;;  %s873_s3 = inlined_call_operand.vmem [shape: f32[24,128], index: 3, kind: output, shape index: {}]  }
   0x1   :  { %v45_v0 = vld [vmem:[%s870_s1 + $0x80] sm:$0xff]  ;;  %v46_v1 = vld [vmem:[%s870_s1 + $0x88] sm:$0xff]  ;;  %v47_v11 = vld [vmem:[%s870_s1 + $0x90] sm:$0xff] }
   0x2   :  { %v77_v2 = vld [vmem:[%s870_s1 + $0x180] sm:$0xff]  ;;  %v487_v3 = vpack.c.bf16 %v46_v1, %v45_v0  ;;  %v78_v4 = vld [vmem:[%s870_s1 + $0x188] sm:$0xff]  ;;  %v48_v13 = vld [vmem:[%s870_s1 + $0x98] sm:$0xff] }
   0x3   :  { %v29_v5 = vld [vmem:[%s870_s1] sm:$0xff]  ;;  %v30_v6 = vld [vmem:[%s870_s1 + $0x8] sm:$0xff]  ;;  %v519_v7 = vpack.c.bf16 %v78_v4, %v77_v2  ;;  %v79_v14 = vld [vmem:[%s870_s1 + $0x190] sm:$0xff]  ;;  %v491_v16 = vpack.c.bf16 %v48_v13, %v47_v11 }
   0x4   :  { %v489_v8 = vpack.c.bf16 %v30_v6, %v29_v5  ;;  %v61_v9 = vld [vmem:[%s870_s1 + $0x100] sm:$0xff]  ;;  %v62_v10 = vld [vmem:[%s870_s1 + $0x108] sm:$0xff]  ;;  %488 = vmatprep.subr.bf16.mxu0 %v487_v3  ;;  %v80_v15 = vld [vmem:[%s870_s1 + $0x198] sm:$0xff] }
   0x5   :  { %v521_v12 = vpack.c.bf16 %v62_v10, %v61_v9  ;;  %520 = vmatprep.subr.bf16.mxu1 %v519_v7  ;;  %v523_v17 = vpack.c.bf16 %v80_v15, %v79_v14  ;;  %v31_v18 = vld [vmem:[%s870_s1 + $0x10] sm:$0xff]  ;;  %v32_v19 = vld [vmem:[%s870_s1 + $0x18] sm:$0xff]  ;;  %v49_v23 = vld [vmem:[%s870_s1 + $0xa0] sm:$0xff] }
   0x6   :  { %490 = vmatpush3.bf16.msra.mxu0 %v489_v8  ;;  %v63_v20 = vld [vmem:[%s870_s1 + $0x110] sm:$0xff]  ;;  %v493_v21 = vpack.c.bf16 %v32_v19, %v31_v18  ;;  %v64_v22 = vld [vmem:[%s870_s1 + $0x118] sm:$0xff]  ;;  %v50_v24 = vld [vmem:[%s870_s1 + $0xa8] sm:$0xff] }
   0x7   :  { %522 = vmatpush3.bf16.msra.mxu1 %v521_v12  ;;  %492 = vmatprep.subr.bf16.mxu0 %v491_v16  ;;  %v525_v25 = vpack.c.bf16 %v64_v22, %v63_v20  ;;  %v495_v26 = vpack.c.bf16 %v50_v24, %v49_v23  ;;  %v81_v27 = vld [vmem:[%s870_s1 + $0x1a0] sm:$0xff]  ;;  %v82_v28 = vld [vmem:[%s870_s1 + $0x1a8] sm:$0xff]  ;;  %v51_v35 = vld [vmem:[%s870_s1 + $0xb0] sm:$0xff] }
   0x8   :  { %524 = vmatprep.subr.bf16.mxu1 %v523_v17  ;;  %v33_v29 = vld [vmem:[%s870_s1 + $0x20] sm:$0xff]  ;;  %v527_v30 = vpack.c.bf16 %v82_v28, %v81_v27  ;;  %v34_v31 = vld [vmem:[%s870_s1 + $0x28] sm:$0xff]  ;;  %v52_v36 = vld [vmem:[%s870_s1 + $0xb8] sm:$0xff] }
   0x9   :  { %v65_v32 = vld [vmem:[%s870_s1 + $0x120] sm:$0xff]  ;;  %v66_v33 = vld [vmem:[%s870_s1 + $0x128] sm:$0xff]  ;;  %v497_v34 = vpack.c.bf16 %v34_v31, %v33_v29  ;;  %v83_v37 = vld [vmem:[%s870_s1 + $0x1b0] sm:$0xff]  ;;  %v499_v39 = vpack.c.bf16 %v52_v36, %v51_v35 }
   0xa   :  { %494 = vmatpush3.bf16.msra.mxu0 %v493_v21  ;;  %v529_v38 = vpack.c.bf16 %v66_v33, %v65_v32  ;;  %v84_v40 = vld [vmem:[%s870_s1 + $0x1b8] sm:$0xff]  ;;  %v35_v41 = vld [vmem:[%s870_s1 + $0x30] sm:$0xff]  ;;  %v53_v46 = vld [vmem:[%s870_s1 + $0xc0] sm:$0xff] }
   0xb   :  { %526 = vmatpush3.bf16.msra.mxu1 %v525_v25  ;;  %496 = vmatprep.subr.bf16.mxu0 %v495_v26  ;;  %v36_v42 = vld [vmem:[%s870_s1 + $0x38] sm:$0xff]  ;;  %v531_v43 = vpack.c.bf16 %v84_v40, %v83_v37  ;;  %v67_v44 = vld [vmem:[%s870_s1 + $0x130] sm:$0xff]  ;;  %v54_v47 = vld [vmem:[%s870_s1 + $0xc8] sm:$0xff] }
   0xc   :  { %528 = vmatprep.subr.bf16.mxu1 %v527_v30  ;;  %v68_v45 = vld [vmem:[%s870_s1 + $0x138] sm:$0xff]  ;;  %v85_v48 = vld [vmem:[%s870_s1 + $0x1c0] sm:$0xff]  ;;  %v86_v49 = vld [vmem:[%s870_s1 + $0x1c8] sm:$0xff]  ;;  %v501_v50 = vpack.c.bf16 %v36_v42, %v35_v41  ;;  %v503_v52 = vpack.c.bf16 %v54_v47, %v53_v46 }
   0xd   :  { %v533_v51 = vpack.c.bf16 %v68_v45, %v67_v44  ;;  %v37_v53 = vld [vmem:[%s870_s1 + $0x40] sm:$0xff]  ;;  %v38_v54 = vld [vmem:[%s870_s1 + $0x48] sm:$0xff]  ;;  %v535_v56 = vpack.c.bf16 %v86_v49, %v85_v48  ;;  %v55_v58 = vld [vmem:[%s870_s1 + $0xd0] sm:$0xff] }
   0xe   :  { %498 = vmatpush3.bf16.msra.mxu0 %v497_v34  ;;  %v69_v55 = vld [vmem:[%s870_s1 + $0x140] sm:$0xff]  ;;  %v70_v57 = vld [vmem:[%s870_s1 + $0x148] sm:$0xff]  ;;  %v56_v59 = vld [vmem:[%s870_s1 + $0xd8] sm:$0xff]  ;;  %v505_v62 = vpack.c.bf16 %v38_v54, %v37_v53 }
   0xf   :  { %530 = vmatpush3.bf16.msra.mxu1 %v529_v38  ;;  %500 = vmatprep.subr.bf16.mxu0 %v499_v39  ;;  %v87_v60 = vld [vmem:[%s870_s1 + $0x1d0] sm:$0xff]  ;;  %v88_v61 = vld [vmem:[%s870_s1 + $0x1d8] sm:$0xff]  ;;  %v537_v63 = vpack.c.bf16 %v70_v57, %v69_v55  ;;  %v507_v0 = vpack.c.bf16 %v56_v59, %v55_v58  ;;  %v57_v6 = vld [vmem:[%s870_s1 + $0xe0] sm:$0xff]  ;;  %v574_v39 = vmov 0.0|0.0   ;;  %v576_v57 = vmov 0.0  }
  0x10   :  { %532 = vmatprep.subr.bf16.mxu1 %v531_v43  ;;  %v39_v1 = vld [vmem:[%s870_s1 + $0x50] sm:$0xff]  ;;  %v40_v2 = vld [vmem:[%s870_s1 + $0x58] sm:$0xff]  ;;  %v539_v4 = vpack.c.bf16 %v88_v61, %v87_v60  ;;  %v58_v7 = vld [vmem:[%s870_s1 + $0xe8] sm:$0xff] }
  0x11   :  { %v71_v3 = vld [vmem:[%s870_s1 + $0x150] sm:$0xff]  ;;  %v72_v5 = vld [vmem:[%s870_s1 + $0x158] sm:$0xff]  ;;  %v89_v8 = vld [vmem:[%s870_s1 + $0x1e0] sm:$0xff]  ;;  %v509_v10 = vpack.c.bf16 %v40_v2, %v39_v1  ;;  %v511_v14 = vpack.c.bf16 %v58_v7, %v57_v6 }
  0x12   :  { %502 = vmatpush3.bf16.msra.mxu0 %v501_v50  ;;  %v90_v9 = vld [vmem:[%s870_s1 + $0x1e8] sm:$0xff]  ;;  %v41_v11 = vld [vmem:[%s870_s1 + $0x60] sm:$0xff]  ;;  %v541_v13 = vpack.c.bf16 %v72_v5, %v71_v3  ;;  %v17_v17 = vld [vmem:[%s871_s0 + $0x18] sm:$0xff] }
  0x13   :  { %534 = vmatpush3.bf16.msra.mxu1 %v533_v51  ;;  %504 = vmatprep.subr.bf16.mxu0 %v503_v52  ;;  %v42_v12 = vld [vmem:[%s870_s1 + $0x68] sm:$0xff]  ;;  %v73_v15 = vld [vmem:[%s870_s1 + $0x160] sm:$0xff]  ;;  %v543_v18 = vpack.c.bf16 %v90_v9, %v89_v8  ;;  %v59_v20 = vld [vmem:[%s870_s1 + $0xf0] sm:$0xff] }
  0x14   :  { %536 = vmatprep.subr.bf16.mxu1 %v535_v56  ;;  %v15_v16 = vld [vmem:[%s871_s0 + $0x8] sm:$0xff]  ;;  %v60_v21 = vld [vmem:[%s870_s1 + $0xf8] sm:$0xff]  ;;  %v91_v22 = vld [vmem:[%s870_s1 + $0x1f0] sm:$0xff]  ;;  %262 = vmatprep.mubr.f32.mxu1 %v17_v17  ;;  %v513_v24 = vpack.c.bf16 %v42_v12, %v41_v11 }
  0x15   :  { %v74_v19 = vld [vmem:[%s870_s1 + $0x168] sm:$0xff]  ;;  %182 = vmatprep.mubr.f32.mxu0 %v15_v16  ;;  %v92_v23 = vld [vmem:[%s870_s1 + $0x1f8] sm:$0xff]  ;;  %v515_v26 = vpack.c.bf16 %v60_v21, %v59_v20  ;;  %v43_v27 = vld [vmem:[%s870_s1 + $0x70] sm:$0xff] }
  0x16   :  { %506 = vmatpush3.bf16.msra.mxu0 %v505_v62  ;;  %v545_v25 = vpack.c.bf16 %v74_v19, %v73_v15  ;;  %v44_v28 = vld [vmem:[%s870_s1 + $0x78] sm:$0xff]  ;;  %v547_v29 = vpack.c.bf16 %v92_v23, %v91_v22  ;;  %v75_v30 = vld [vmem:[%s870_s1 + $0x170] sm:$0xff]  ;;  %v93_v34 = vld [vmem:[%s870_s1 + $0x200] sm:$0xff] }
  0x17   :  { %538 = vmatpush3.bf16.msra.mxu1 %v537_v63  ;;  %508 = vmatprep.subr.bf16.mxu0 %v507_v0  ;;  %v76_v31 = vld [vmem:[%s870_s1 + $0x178] sm:$0xff]  ;;  %v517_v32 = vpack.c.bf16 %v44_v28, %v43_v27  ;;  %v94_v35 = vld [vmem:[%s870_s1 + $0x208] sm:$0xff]  ;;  %v14_v36 = vld [vmem:[%s871_s0] sm:$0xff] }
  0x18   :  { %540 = vmatprep.subr.bf16.mxu1 %v539_v4  ;;  %v549_v33 = vpack.c.bf16 %v76_v31, %v75_v30  ;;  %v552_v37 = vpack.c.bf16 %v94_v35, %v93_v34  ;;  %v16_v38 = vld [vmem:[%s871_s0 + $0x10] sm:$0xff]  ;;  %v96_v41 = vld [vmem:[%s870_s1 + $0x218] sm:$0xff]  ;;  %v19_v43 = vld [vmem:[%s871_s0 + $0x28] sm:$0xff] }
  0x19   :  { %v95_v40 = vld [vmem:[%s870_s1 + $0x210] sm:$0xff]  ;;  %v22_v45 = vld [vmem:[%s871_s0 + $0x40] sm:$0xff]  ;;  %v21_v46 = vld [vmem:[%s871_s0 + $0x38] sm:$0xff] }
  0x1a   :  { %510 = vmatpush3.bf16.msra.mxu0 %v509_v10  ;;  %v20_v42 = vld [vmem:[%s871_s0 + $0x30] sm:$0xff]  ;;  %v555_v44 = vpack.c.bf16 %v96_v41, %v95_v40  ;;  %v97_v47 = vld [vmem:[%s870_s1 + $0x220] sm:$0xff]  ;;  %v98_v48 = vld [vmem:[%s870_s1 + $0x228] sm:$0xff] }
  0x1b   :  { %542 = vmatpush3.bf16.msra.mxu1 %v541_v13  ;;  %512 = vmatprep.subr.bf16.mxu0 %v511_v14  ;;  %v25_v49 = vld [vmem:[%s871_s0 + $0x58] sm:$0xff]  ;;  %v24_v50 = vld [vmem:[%s871_s0 + $0x50] sm:$0xff]  ;;  %v558_v51 = vpack.c.bf16 %v98_v48, %v97_v47  ;;  %v27_v52 = vld [vmem:[%s871_s0 + $0x68] sm:$0xff] }
  0x1c   :  { %544 = vmatprep.subr.bf16.mxu1 %v543_v18  ;;  %v26_v53 = vld [vmem:[%s871_s0 + $0x60] sm:$0xff]  ;;  %v99_v54 = vld [vmem:[%s870_s1 + $0x230] sm:$0xff]  ;;  %v100_v55 = vld [vmem:[%s870_s1 + $0x238] sm:$0xff] }
  0x1d   :  { %v561_v56 = vpack.c.bf16 %v100_v55, %v99_v54  ;;  %v18_v58 = vld [vmem:[%s871_s0 + $0x20] sm:$0xff]  ;;  %v23_v59 = vld [vmem:[%s871_s0 + $0x48] sm:$0xff]  ;;  %v28_v60 = vld [vmem:[%s871_s0 + $0x70] sm:$0xff] }
  0x1e   :  { %514 = vmatpush3.bf16.msra.mxu0 %v513_v24  ;;  %v365_v63 = vld [vmem:[%s872_s2] ss:$0 sm:$0xff] }
  0x1f   :  { %546 = vmatpush3.bf16.msra.mxu1 %v545_v25  ;;  %516 = vmatprep.subr.bf16.mxu0 %v515_v26 }
  0x20   :  { %548 = vmatprep.subr.bf16.mxu1 %v547_v29 }
  0x22   :  { %518 = vmatpush3.bf16.msra.mxu0 %v517_v32 }
  0x23   :  { %550 = vmatpush3.bf16.msra.mxu1 %v549_v33  ;;  %551 = vmatprep.subr.bf16.mxu0 %v574_v39 }
  0x24   :  { %563 = vmatprep.subr.bf16.mxu1 %v574_v39 }
  0x25   :  { %183 = vmatmul.mubr.f32.vlgmr.msra.gmra.mrb[0].mxu0 %v14_v36 }
  0x26   :  { %263 = vmatmul.mubr.f32.vlgmr.msra.gmra.mrb[0].mxu1 %v16_v38  ;;  %553 = vmatpush3.bf16.msra.mxu0 %v552_v37 }
  0x27   :  { %567 = vmatpush3.bf16.msra.mxu1 %v552_v37  ;;  %187 = vmatprep.mubr.f32.mxu0 %v20_v42 }
  0x28   :  { %554 = vmatprep.subr.bf16.mxu0 %v574_v39  ;;  %564 = vmatprep.subr.bf16.mxu1 %v574_v39 }
  0x29   :  { %188 = vmatmul.mubr.f32.gmra.mrb[2].mxu0 %v19_v43  ;;  %267 = vmatprep.mubr.f32.mxu1 %v22_v45 }
  0x2a   :  { %556 = vmatpush3.bf16.msra.mxu0 %v555_v44  ;;  %268 = vmatmul.mubr.f32.gmra.mrb[2].mxu1 %v21_v46 }
  0x2b   :  { %568 = vmatpush3.bf16.msra.mxu1 %v555_v44  ;;  %192 = vmatprep.mubr.f32.mxu0 %v25_v49 }
  0x2c   :  { %557 = vmatprep.subr.bf16.mxu0 %v574_v39  ;;  %565 = vmatprep.subr.bf16.mxu1 %v574_v39 }
  0x2d   :  { %193 = vmatmul.mubr.f32.gmra.mrb[4].mxu0 %v24_v50  ;;  %272 = vmatprep.mubr.f32.mxu1 %v27_v52 }
  0x2e   :  { %559 = vmatpush3.bf16.msra.mxu0 %v558_v51  ;;  %273 = vmatmul.mubr.f32.gmra.mrb[4].mxu1 %v26_v53 }
  0x2f   :  { %569 = vmatpush3.bf16.msra.mxu1 %v558_v51  ;;  %560 = vmatprep.subr.bf16.mxu0 %v574_v39 }
  0x30   :  { %566 = vmatprep.subr.bf16.mxu1 %v574_v39  ;;  %478 = vmatprep.mubr.msk.f32.mxu0 %vm575_vm0, %v576_v57 }
  0x31   :  { %481 = vmatprep.mubr.msk.f32.mxu1 %vm575_vm0, %v576_v57 }
  0x32   :  { %562 = vmatpush3.bf16.msra.mxu0 %v561_v56 }
  0x33   :  { %570 = vmatpush3.bf16.msra.mxu1 %v561_v56 }
  0x35   :  { %479 = vmatmul.mubr.msk.f32.vlgmr.msra.gmra.mrb[6].mxu0 %vm108_vm1, %v18_v58 }
  0x36   :  { %482 = vmatmul.mubr.msk.f32.vlgmr.msra.gmra.mrb[6].mxu1 %vm108_vm1, %v23_v59 }
  0x37   :  { %484 = vmatprep.mubr.msk.f32.mxu1 %vm575_vm0, %v576_v57 }
  0x3a   :  { %485 = vmatmul.mubr.msk.f32.gmra.mrb[8].mxu1 %vm108_vm1, %v28_v60 }
  0xf8   :  { %v401_v61 = vpop.f32.mrb[0].mxu0 }
  0xf9   :  { %v442_v62 = vpop.f32.mrb[0].mxu1  ;;  %v402_v0 = vpop.f32.mrb[1].mxu0 }
  0xfa   :  { %v403_v1 = vadd.f32 %v402_v0, %v401_v61  ;;  %v443_v2 = vpop.f32.mrb[1].mxu1 }
  0xfb   :  { %v444_v3 = vadd.f32 %v443_v2, %v442_v62 }
  0xfc   :  { %v185_v4 = vadd.f32 %v403_v1, %v365_v63  ;;  %v404_v5 = vpop.f32.mrb[2].mxu0 }
  0xfd   :  { %v405_v6 = vpop.f32.mrb[3].mxu0  ;;  %v445_v7 = vpop.f32.mrb[2].mxu1 }
  0xfe   :  { %v406_v8 = vadd.f32 %v405_v6, %v404_v5  ;;  %v446_v9 = vpop.f32.mrb[3].mxu1  ;;  %v265_v10 = vadd.f32 %v444_v3, %v185_v4 }
  0xff   :  { %v447_v11 = vadd.f32 %v446_v9, %v445_v7 }
 0x100   :  { %v190_v12 = vadd.f32 %v406_v8, %v365_v63  ;;  %v407_v13 = vpop.f32.mrb[4].mxu0 }
 0x101   :  { %v408_v14 = vpop.f32.mrb[5].mxu0  ;;  %v448_v15 = vpop.f32.mrb[4].mxu1 }
 0x102   :  { %v409_v16 = vadd.f32 %v408_v14, %v407_v13  ;;  %v449_v17 = vpop.f32.mrb[5].mxu1  ;;  %v270_v18 = vadd.f32 %v447_v11, %v190_v12 }
 0x103   :  { %v450_v19 = vadd.f32 %v449_v17, %v448_v15 }
 0x104   :  { %v195_v20 = vadd.f32 %v409_v16, %v365_v63 }
 0x106   :  { %v275_v21 = vadd.f32 %v450_v19, %v195_v20 }
 0x108   :  { %v344_v22 = vpop.f32.mrb[6].mxu0 }
 0x109   :  { %v345_v23 = vadd.f32 %v344_v22, %v265_v10  ;;  %v349_v24 = vpop.f32.mrb[6].mxu1  ;;  %v480_v25 = vpop.f32.mrb[7].mxu0 }
 0x10a   :  { %v350_v26 = vadd.f32 %v349_v24, %v270_v18  ;;  %v483_v27 = vpop.f32.mrb[7].mxu1 }
 0x10b   :  { %358 = vst [vmem:[%s873_s3] sm:$0xff] %v345_v23 }
 0x10c   :  { %359 = vst [vmem:[%s873_s3 + $0x8] sm:$0xff] %v350_v26 }
 0x10d   :  { %v354_v28 = vpop.f32.mrb[8].mxu1 }
 0x10e   :  { %v355_v29 = vadd.f32 %v354_v28, %v275_v21  ;;  %v486_v30 = vpop.f32.mrb[9].mxu1 }
 0x110   :  { %360 = vst [vmem:[%s873_s3 + $0x10] sm:$0xff] %v355_v29 }

// kernel: dqn_forward.7
= control target key start
LH: loop header
LB: loop body
LE: loop exit
PB: predicated region body
PF: predicated region fallthrough
CT: control target
= control target key end

     0   :  { %vm335_vm0 = vcmask 523264   ;;  %s2536_s1 = inlined_call_operand.vmem [shape: f32[576,512], index: 1, kind: input, shape index: {}]   ;;  %s2537_s0 = inlined_call_operand.vmem [shape: f32[8,576], index: 0, kind: input, shape index: {}]   ;;  %s2538_s3 = inlined_call_operand.vmem [shape: f32[512,128], index: 3, kind: input, shape index: {}]   ;;  %s2539_s2 = inlined_call_operand.vmem [shape: f32[1,512], index: 2, kind: input, shape index: {}]   ;;  %s2540_s4 = inlined_call_operand.vmem [shape: f32[1,128], index: 4, kind: input, shape index: {}]   ;;  %s2541_s5 = inlined_call_operand.vmem [shape: f32[8,128], index: 5, kind: output, shape index: {}]  }
   0x1   :  { %v26_v0 = vld [vmem:[%s2536_s1 + $0x8] sm:$0xff]  ;;  %v28_v2 = vld [vmem:[%s2536_s1 + $0x18] sm:$0xff]  ;;  %v25_v5 = vld [vmem:[%s2536_s1] sm:$0xff] }
   0x2   :  { %v30_v1 = vld [vmem:[%s2536_s1 + $0x28] sm:$0xff]  ;;  %v32_v4 = vld [vmem:[%s2536_s1 + $0x38] sm:$0xff]  ;;  %v29_v6 = vld [vmem:[%s2536_s1 + $0x20] sm:$0xff] }
   0x3   :  { %v1058_v3 = vpack.c.bf16 %v30_v1, %v26_v0  ;;  %v1202_v7 = vpack.c.bf16 %v32_v4, %v28_v2  ;;  %v1060_v8 = vpack.c.bf16 %v29_v6, %v25_v5  ;;  %v27_v9 = vld [vmem:[%s2536_s1 + $0x10] sm:$0xff]  ;;  %v34_v11 = vld [vmem:[%s2536_s1 + $0x48] sm:$0xff]  ;;  %v36_v14 = vld [vmem:[%s2536_s1 + $0x58] sm:$0xff] }
   0x4   :  { %v31_v10 = vld [vmem:[%s2536_s1 + $0x30] sm:$0xff]  ;;  %v38_v13 = vld [vmem:[%s2536_s1 + $0x68] sm:$0xff]  ;;  %v40_v15 = vld [vmem:[%s2536_s1 + $0x78] sm:$0xff] }
   0x5   :  { %1059 = vmatprep.subr.bf16.mxu0 %v1058_v3  ;;  %v1204_v12 = vpack.c.bf16 %v31_v10, %v27_v9  ;;  %1203 = vmatprep.subr.bf16.mxu1 %v1202_v7  ;;  %v1062_v16 = vpack.c.bf16 %v38_v13, %v34_v11  ;;  %v1206_v17 = vpack.c.bf16 %v40_v15, %v36_v14  ;;  %v33_v18 = vld [vmem:[%s2536_s1 + $0x40] sm:$0xff]  ;;  %v35_v20 = vld [vmem:[%s2536_s1 + $0x50] sm:$0xff]  ;;  %v42_v23 = vld [vmem:[%s2536_s1 + $0x88] sm:$0xff] }
   0x6   :  { %1061 = vmatpush1.bf16.msra.mxu0 %v1060_v8  ;;  %v37_v19 = vld [vmem:[%s2536_s1 + $0x60] sm:$0xff]  ;;  %v39_v22 = vld [vmem:[%s2536_s1 + $0x70] sm:$0xff]  ;;  %v46_v24 = vld [vmem:[%s2536_s1 + $0xa8] sm:$0xff] }
   0x7   :  { %1205 = vmatpush1.bf16.msra.mxu1 %v1204_v12  ;;  %v1064_v21 = vpack.c.bf16 %v37_v19, %v33_v18  ;;  %1063 = vmatprep.subr.bf16.mxu0 %v1062_v16  ;;  %v1208_v25 = vpack.c.bf16 %v39_v22, %v35_v20  ;;  %v1066_v26 = vpack.c.bf16 %v46_v24, %v42_v23  ;;  %v44_v27 = vld [vmem:[%s2536_s1 + $0x98] sm:$0xff]  ;;  %v41_v29 = vld [vmem:[%s2536_s1 + $0x80] sm:$0xff]  ;;  %v43_v32 = vld [vmem:[%s2536_s1 + $0x90] sm:$0xff] }
   0x8   :  { %1207 = vmatprep.subr.bf16.mxu1 %v1206_v17  ;;  %v48_v28 = vld [vmem:[%s2536_s1 + $0xb8] sm:$0xff]  ;;  %v45_v31 = vld [vmem:[%s2536_s1 + $0xa0] sm:$0xff]  ;;  %v47_v33 = vld [vmem:[%s2536_s1 + $0xb0] sm:$0xff] }
   0x9   :  { %v1210_v30 = vpack.c.bf16 %v48_v28, %v44_v27  ;;  %v1068_v34 = vpack.c.bf16 %v45_v31, %v41_v29  ;;  %v50_v35 = vld [vmem:[%s2536_s1 + $0xc8] sm:$0xff]  ;;  %v52_v37 = vld [vmem:[%s2536_s1 + $0xd8] sm:$0xff]  ;;  %v1212_v38 = vpack.c.bf16 %v47_v33, %v43_v32  ;;  %v49_v41 = vld [vmem:[%s2536_s1 + $0xc0] sm:$0xff] }
   0xa   :  { %1065 = vmatpush1.bf16.msra.mxu0 %v1064_v21  ;;  %v54_v36 = vld [vmem:[%s2536_s1 + $0xe8] sm:$0xff]  ;;  %v56_v40 = vld [vmem:[%s2536_s1 + $0xf8] sm:$0xff]  ;;  %v53_v42 = vld [vmem:[%s2536_s1 + $0xe0] sm:$0xff] }
   0xb   :  { %1209 = vmatpush1.bf16.msra.mxu1 %v1208_v25  ;;  %1067 = vmatprep.subr.bf16.mxu0 %v1066_v26  ;;  %v1070_v39 = vpack.c.bf16 %v54_v36, %v50_v35  ;;  %v1214_v43 = vpack.c.bf16 %v56_v40, %v52_v37  ;;  %v51_v44 = vld [vmem:[%s2536_s1 + $0xd0] sm:$0xff]  ;;  %v58_v46 = vld [vmem:[%s2536_s1 + $0x108] sm:$0xff]  ;;  %v60_v48 = vld [vmem:[%s2536_s1 + $0x118] sm:$0xff]  ;;  %v1072_v50 = vpack.c.bf16 %v53_v42, %v49_v41 }
   0xc   :  { %1211 = vmatprep.subr.bf16.mxu1 %v1210_v30  ;;  %v55_v45 = vld [vmem:[%s2536_s1 + $0xf0] sm:$0xff]  ;;  %v62_v47 = vld [vmem:[%s2536_s1 + $0x128] sm:$0xff]  ;;  %v64_v49 = vld [vmem:[%s2536_s1 + $0x138] sm:$0xff] }
   0xd   :  { %v1216_v51 = vpack.c.bf16 %v55_v45, %v51_v44  ;;  %v1074_v52 = vpack.c.bf16 %v62_v47, %v58_v46  ;;  %v57_v53 = vld [vmem:[%s2536_s1 + $0x100] sm:$0xff]  ;;  %v59_v55 = vld [vmem:[%s2536_s1 + $0x110] sm:$0xff]  ;;  %v1218_v56 = vpack.c.bf16 %v64_v49, %v60_v48  ;;  %v66_v58 = vld [vmem:[%s2536_s1 + $0x148] sm:$0xff] }
   0xe   :  { %1069 = vmatpush1.bf16.msra.mxu0 %v1068_v34  ;;  %v61_v54 = vld [vmem:[%s2536_s1 + $0x120] sm:$0xff]  ;;  %v63_v57 = vld [vmem:[%s2536_s1 + $0x130] sm:$0xff]  ;;  %v70_v59 = vld [vmem:[%s2536_s1 + $0x168] sm:$0xff] }
   0xf   :  { %1213 = vmatpush1.bf16.msra.mxu1 %v1212_v38  ;;  %1071 = vmatprep.subr.bf16.mxu0 %v1070_v39  ;;  %v68_v60 = vld [vmem:[%s2536_s1 + $0x158] sm:$0xff]  ;;  %v1076_v62 = vpack.c.bf16 %v61_v54, %v57_v53  ;;  %v1220_v63 = vpack.c.bf16 %v63_v57, %v59_v55  ;;  %v1078_v0 = vpack.c.bf16 %v70_v59, %v66_v58  ;;  %v65_v1 = vld [vmem:[%s2536_s1 + $0x140] sm:$0xff]  ;;  %v67_v3 = vld [vmem:[%s2536_s1 + $0x150] sm:$0xff] }
  0x10   :  { %1215 = vmatprep.subr.bf16.mxu1 %v1214_v43  ;;  %v72_v61 = vld [vmem:[%s2536_s1 + $0x178] sm:$0xff]  ;;  %v69_v2 = vld [vmem:[%s2536_s1 + $0x160] sm:$0xff]  ;;  %v71_v5 = vld [vmem:[%s2536_s1 + $0x170] sm:$0xff] }
  0x11   :  { %v1222_v4 = vpack.c.bf16 %v72_v61, %v68_v60  ;;  %v74_v6 = vld [vmem:[%s2536_s1 + $0x188] sm:$0xff]  ;;  %v76_v8 = vld [vmem:[%s2536_s1 + $0x198] sm:$0xff]  ;;  %v1080_v10 = vpack.c.bf16 %v69_v2, %v65_v1  ;;  %v1224_v11 = vpack.c.bf16 %v71_v5, %v67_v3  ;;  %v73_v13 = vld [vmem:[%s2536_s1 + $0x180] sm:$0xff] }
  0x12   :  { %1073 = vmatpush1.bf16.msra.mxu0 %v1072_v50  ;;  %v78_v7 = vld [vmem:[%s2536_s1 + $0x1a8] sm:$0xff]  ;;  %v80_v9 = vld [vmem:[%s2536_s1 + $0x1b8] sm:$0xff]  ;;  %v77_v14 = vld [vmem:[%s2536_s1 + $0x1a0] sm:$0xff] }
  0x13   :  { %1217 = vmatpush1.bf16.msra.mxu1 %v1216_v51  ;;  %1075 = vmatprep.subr.bf16.mxu0 %v1074_v52  ;;  %v1082_v12 = vpack.c.bf16 %v78_v7, %v74_v6  ;;  %v75_v15 = vld [vmem:[%s2536_s1 + $0x190] sm:$0xff]  ;;  %v1226_v16 = vpack.c.bf16 %v80_v9, %v76_v8  ;;  %v82_v18 = vld [vmem:[%s2536_s1 + $0x1c8] sm:$0xff]  ;;  %v84_v20 = vld [vmem:[%s2536_s1 + $0x1d8] sm:$0xff]  ;;  %v1084_v22 = vpack.c.bf16 %v77_v14, %v73_v13 }
  0x14   :  { %1219 = vmatprep.subr.bf16.mxu1 %v1218_v56  ;;  %v79_v17 = vld [vmem:[%s2536_s1 + $0x1b0] sm:$0xff]  ;;  %v86_v19 = vld [vmem:[%s2536_s1 + $0x1e8] sm:$0xff]  ;;  %v88_v21 = vld [vmem:[%s2536_s1 + $0x1f8] sm:$0xff] }
  0x15   :  { %v1228_v23 = vpack.c.bf16 %v79_v17, %v75_v15  ;;  %v1086_v24 = vpack.c.bf16 %v86_v19, %v82_v18  ;;  %v81_v25 = vld [vmem:[%s2536_s1 + $0x1c0] sm:$0xff]  ;;  %v83_v27 = vld [vmem:[%s2536_s1 + $0x1d0] sm:$0xff]  ;;  %v1230_v28 = vpack.c.bf16 %v88_v21, %v84_v20  ;;  %v90_v30 = vld [vmem:[%s2536_s1 + $0x208] sm:$0xff] }
  0x16   :  { %1077 = vmatpush1.bf16.msra.mxu0 %v1076_v62  ;;  %v85_v26 = vld [vmem:[%s2536_s1 + $0x1e0] sm:$0xff]  ;;  %v87_v29 = vld [vmem:[%s2536_s1 + $0x1f0] sm:$0xff]  ;;  %v94_v31 = vld [vmem:[%s2536_s1 + $0x228] sm:$0xff] }
  0x17   :  { %1221 = vmatpush1.bf16.msra.mxu1 %v1220_v63  ;;  %1079 = vmatprep.subr.bf16.mxu0 %v1078_v0  ;;  %v92_v32 = vld [vmem:[%s2536_s1 + $0x218] sm:$0xff]  ;;  %v1088_v34 = vpack.c.bf16 %v85_v26, %v81_v25  ;;  %v1232_v35 = vpack.c.bf16 %v87_v29, %v83_v27  ;;  %v1090_v36 = vpack.c.bf16 %v94_v31, %v90_v30  ;;  %v89_v37 = vld [vmem:[%s2536_s1 + $0x200] sm:$0xff]  ;;  %v91_v39 = vld [vmem:[%s2536_s1 + $0x210] sm:$0xff] }
  0x18   :  { %1223 = vmatprep.subr.bf16.mxu1 %v1222_v4  ;;  %v96_v33 = vld [vmem:[%s2536_s1 + $0x238] sm:$0xff]  ;;  %v93_v38 = vld [vmem:[%s2536_s1 + $0x220] sm:$0xff]  ;;  %v95_v41 = vld [vmem:[%s2536_s1 + $0x230] sm:$0xff] }
  0x19   :  { %v1234_v40 = vpack.c.bf16 %v96_v33, %v92_v32  ;;  %v98_v42 = vld [vmem:[%s2536_s1 + $0x248] sm:$0xff]  ;;  %v100_v44 = vld [vmem:[%s2536_s1 + $0x258] sm:$0xff]  ;;  %v1092_v46 = vpack.c.bf16 %v93_v38, %v89_v37  ;;  %v1236_v47 = vpack.c.bf16 %v95_v41, %v91_v39  ;;  %v97_v49 = vld [vmem:[%s2536_s1 + $0x240] sm:$0xff] }
  0x1a   :  { %1081 = vmatpush1.bf16.msra.mxu0 %v1080_v10  ;;  %v102_v43 = vld [vmem:[%s2536_s1 + $0x268] sm:$0xff]  ;;  %v104_v45 = vld [vmem:[%s2536_s1 + $0x278] sm:$0xff]  ;;  %v101_v50 = vld [vmem:[%s2536_s1 + $0x260] sm:$0xff] }
  0x1b   :  { %1225 = vmatpush1.bf16.msra.mxu1 %v1224_v11  ;;  %1083 = vmatprep.subr.bf16.mxu0 %v1082_v12  ;;  %v1094_v48 = vpack.c.bf16 %v102_v43, %v98_v42  ;;  %v99_v51 = vld [vmem:[%s2536_s1 + $0x250] sm:$0xff]  ;;  %v1238_v52 = vpack.c.bf16 %v104_v45, %v100_v44  ;;  %v106_v54 = vld [vmem:[%s2536_s1 + $0x288] sm:$0xff]  ;;  %v108_v56 = vld [vmem:[%s2536_s1 + $0x298] sm:$0xff]  ;;  %v1096_v58 = vpack.c.bf16 %v101_v50, %v97_v49 }
  0x1c   :  { %1227 = vmatprep.subr.bf16.mxu1 %v1226_v16  ;;  %v103_v53 = vld [vmem:[%s2536_s1 + $0x270] sm:$0xff]  ;;  %v110_v55 = vld [vmem:[%s2536_s1 + $0x2a8] sm:$0xff]  ;;  %v112_v57 = vld [vmem:[%s2536_s1 + $0x2b8] sm:$0xff] }
  0x1d   :  { %v1240_v59 = vpack.c.bf16 %v103_v53, %v99_v51  ;;  %v1098_v60 = vpack.c.bf16 %v110_v55, %v106_v54  ;;  %v105_v61 = vld [vmem:[%s2536_s1 + $0x280] sm:$0xff]  ;;  %v107_v63 = vld [vmem:[%s2536_s1 + $0x290] sm:$0xff]  ;;  %v1242_v0 = vpack.c.bf16 %v112_v57, %v108_v56  ;;  %v114_v2 = vld [vmem:[%s2536_s1 + $0x2c8] sm:$0xff] }
  0x1e   :  { %1085 = vmatpush1.bf16.msra.mxu0 %v1084_v22  ;;  %v109_v62 = vld [vmem:[%s2536_s1 + $0x2a0] sm:$0xff]  ;;  %v111_v1 = vld [vmem:[%s2536_s1 + $0x2b0] sm:$0xff]  ;;  %v118_v3 = vld [vmem:[%s2536_s1 + $0x2e8] sm:$0xff] }
  0x1f   :  { %1229 = vmatpush1.bf16.msra.mxu1 %v1228_v23  ;;  %1087 = vmatprep.subr.bf16.mxu0 %v1086_v24  ;;  %v116_v4 = vld [vmem:[%s2536_s1 + $0x2d8] sm:$0xff]  ;;  %v1100_v6 = vpack.c.bf16 %v109_v62, %v105_v61  ;;  %v113_v7 = vld [vmem:[%s2536_s1 + $0x2c0] sm:$0xff]  ;;  %v1244_v8 = vpack.c.bf16 %v111_v1, %v107_v63  ;;  %v1102_v9 = vpack.c.bf16 %v118_v3, %v114_v2  ;;  %v115_v11 = vld [vmem:[%s2536_s1 + $0x2d0] sm:$0xff] }
  0x20   :  { %1231 = vmatprep.subr.bf16.mxu1 %v1230_v28  ;;  %v120_v5 = vld [vmem:[%s2536_s1 + $0x2f8] sm:$0xff]  ;;  %v117_v10 = vld [vmem:[%s2536_s1 + $0x2e0] sm:$0xff]  ;;  %v119_v12 = vld [vmem:[%s2536_s1 + $0x2f0] sm:$0xff] }
  0x21   :  { %v1246_v13 = vpack.c.bf16 %v120_v5, %v116_v4  ;;  %v122_v14 = vld [vmem:[%s2536_s1 + $0x308] sm:$0xff]  ;;  %v124_v17 = vld [vmem:[%s2536_s1 + $0x318] sm:$0xff]  ;;  %v1104_v19 = vpack.c.bf16 %v117_v10, %v113_v7  ;;  %v1248_v20 = vpack.c.bf16 %v119_v12, %v115_v11  ;;  %v121_v22 = vld [vmem:[%s2536_s1 + $0x300] sm:$0xff] }
  0x22   :  { %1089 = vmatpush1.bf16.msra.mxu0 %v1088_v34  ;;  %v126_v15 = vld [vmem:[%s2536_s1 + $0x328] sm:$0xff]  ;;  %v128_v18 = vld [vmem:[%s2536_s1 + $0x338] sm:$0xff]  ;;  %v125_v23 = vld [vmem:[%s2536_s1 + $0x320] sm:$0xff] }
  0x23   :  { %1233 = vmatpush1.bf16.msra.mxu1 %v1232_v35  ;;  %1091 = vmatprep.subr.bf16.mxu0 %v1090_v36  ;;  %v21_v16 = vld [vmem:[%s2537_s0 + $0x8] sm:$0xff]  ;;  %v1106_v21 = vpack.c.bf16 %v126_v15, %v122_v14  ;;  %v123_v24 = vld [vmem:[%s2536_s1 + $0x310] sm:$0xff]  ;;  %v1250_v25 = vpack.c.bf16 %v128_v18, %v124_v17  ;;  %v132_v29 = vld [vmem:[%s2536_s1 + $0x358] sm:$0xff]  ;;  %v1108_v31 = vpack.c.bf16 %v125_v23, %v121_v22 }
  0x24   :  { %1235 = vmatprep.subr.bf16.mxu1 %v1234_v40  ;;  %403 = vmatprep.mubr.f32.mxu0 %v21_v16  ;;  %v127_v26 = vld [vmem:[%s2536_s1 + $0x330] sm:$0xff]  ;;  %v130_v27 = vld [vmem:[%s2536_s1 + $0x348] sm:$0xff]  ;;  %v136_v30 = vld [vmem:[%s2536_s1 + $0x378] sm:$0xff] }
  0x25   :  { %616 = vmatprep.mubr.f32.mxu1 %v21_v16  ;;  %v134_v28 = vld [vmem:[%s2536_s1 + $0x368] sm:$0xff]  ;;  %v1252_v32 = vpack.c.bf16 %v127_v26, %v123_v24  ;;  %v129_v34 = vld [vmem:[%s2536_s1 + $0x340] sm:$0xff]  ;;  %v131_v36 = vld [vmem:[%s2536_s1 + $0x350] sm:$0xff]  ;;  %v1254_v37 = vpack.c.bf16 %v136_v30, %v132_v29 }
  0x26   :  { %1093 = vmatpush1.bf16.msra.mxu0 %v1092_v46  ;;  %v1110_v33 = vpack.c.bf16 %v134_v28, %v130_v27  ;;  %v133_v35 = vld [vmem:[%s2536_s1 + $0x360] sm:$0xff]  ;;  %v135_v38 = vld [vmem:[%s2536_s1 + $0x370] sm:$0xff]  ;;  %v138_v39 = vld [vmem:[%s2536_s1 + $0x388] sm:$0xff] }
  0x27   :  { %1237 = vmatpush1.bf16.msra.mxu1 %v1236_v47  ;;  %1095 = vmatprep.subr.bf16.mxu0 %v1094_v48  ;;  %v142_v40 = vld [vmem:[%s2536_s1 + $0x3a8] sm:$0xff]  ;;  %v140_v41 = vld [vmem:[%s2536_s1 + $0x398] sm:$0xff]  ;;  %v1112_v43 = vpack.c.bf16 %v133_v35, %v129_v34  ;;  %v1256_v44 = vpack.c.bf16 %v135_v38, %v131_v36  ;;  %v137_v46 = vld [vmem:[%s2536_s1 + $0x380] sm:$0xff] }
  0x28   :  { %1239 = vmatprep.subr.bf16.mxu1 %v1238_v52  ;;  %v144_v42 = vld [vmem:[%s2536_s1 + $0x3b8] sm:$0xff]  ;;  %v1114_v45 = vpack.c.bf16 %v142_v40, %v138_v39  ;;  %v141_v47 = vld [vmem:[%s2536_s1 + $0x3a0] sm:$0xff]  ;;  %v139_v48 = vld [vmem:[%s2536_s1 + $0x390] sm:$0xff] }
  0x29   :  { %v1258_v49 = vpack.c.bf16 %v144_v42, %v140_v41  ;;  %v143_v50 = vld [vmem:[%s2536_s1 + $0x3b0] sm:$0xff]  ;;  %v146_v51 = vld [vmem:[%s2536_s1 + $0x3c8] sm:$0xff]  ;;  %v148_v53 = vld [vmem:[%s2536_s1 + $0x3d8] sm:$0xff]  ;;  %v1116_v55 = vpack.c.bf16 %v141_v47, %v137_v46 }
  0x2a   :  { %1097 = vmatpush1.bf16.msra.mxu0 %v1096_v58  ;;  %v150_v52 = vld [vmem:[%s2536_s1 + $0x3e8] sm:$0xff]  ;;  %v152_v54 = vld [vmem:[%s2536_s1 + $0x3f8] sm:$0xff]  ;;  %v1260_v56 = vpack.c.bf16 %v143_v50, %v139_v48  ;;  %v145_v58 = vld [vmem:[%s2536_s1 + $0x3c0] sm:$0xff] }
  0x2b   :  { %1241 = vmatpush1.bf16.msra.mxu1 %v1240_v59  ;;  %1099 = vmatprep.subr.bf16.mxu0 %v1098_v60  ;;  %v1118_v57 = vpack.c.bf16 %v150_v52, %v146_v51  ;;  %v149_v59 = vld [vmem:[%s2536_s1 + $0x3e0] sm:$0xff]  ;;  %v147_v60 = vld [vmem:[%s2536_s1 + $0x3d0] sm:$0xff]  ;;  %v1262_v61 = vpack.c.bf16 %v152_v54, %v148_v53  ;;  %v154_v63 = vld [vmem:[%s2536_s1 + $0x408] sm:$0xff] }
  0x2c   :  { %1243 = vmatprep.subr.bf16.mxu1 %v1242_v0  ;;  %v151_v62 = vld [vmem:[%s2536_s1 + $0x3f0] sm:$0xff]  ;;  %v158_v0 = vld [vmem:[%s2536_s1 + $0x428] sm:$0xff]  ;;  %v156_v1 = vld [vmem:[%s2536_s1 + $0x418] sm:$0xff]  ;;  %v1120_v3 = vpack.c.bf16 %v149_v59, %v145_v58 }
  0x2d   :  { %v160_v2 = vld [vmem:[%s2536_s1 + $0x438] sm:$0xff]  ;;  %v1264_v4 = vpack.c.bf16 %v151_v62, %v147_v60  ;;  %v1122_v5 = vpack.c.bf16 %v158_v0, %v154_v63  ;;  %v157_v7 = vld [vmem:[%s2536_s1 + $0x420] sm:$0xff]  ;;  %v159_v10 = vld [vmem:[%s2536_s1 + $0x430] sm:$0xff] }
  0x2e   :  { %1101 = vmatpush1.bf16.msra.mxu0 %v1100_v6  ;;  %v153_v6 = vld [vmem:[%s2536_s1 + $0x400] sm:$0xff]  ;;  %v162_v11 = vld [vmem:[%s2536_s1 + $0x448] sm:$0xff]  ;;  %v168_v14 = vld [vmem:[%s2536_s1 + $0x478] sm:$0xff] }
  0x2f   :  { %1245 = vmatpush1.bf16.msra.mxu1 %v1244_v8  ;;  %1103 = vmatprep.subr.bf16.mxu0 %v1102_v9  ;;  %v155_v8 = vld [vmem:[%s2536_s1 + $0x410] sm:$0xff]  ;;  %v1266_v9 = vpack.c.bf16 %v160_v2, %v156_v1  ;;  %v166_v12 = vld [vmem:[%s2536_s1 + $0x468] sm:$0xff]  ;;  %v20_v15 = vld [vmem:[%s2537_s0] sm:$0xff]  ;;  %v1124_v16 = vpack.c.bf16 %v157_v7, %v153_v6 }
  0x30   :  { %1247 = vmatprep.subr.bf16.mxu1 %v1246_v13  ;;  %v164_v13 = vld [vmem:[%s2536_s1 + $0x458] sm:$0xff]  ;;  %v1268_v17 = vpack.c.bf16 %v159_v10, %v155_v8  ;;  %v1126_v18 = vpack.c.bf16 %v166_v12, %v162_v11  ;;  %v167_v23 = vld [vmem:[%s2536_s1 + $0x470] sm:$0xff]  ;;  %v170_v24 = vld [vmem:[%s2536_s1 + $0x488] sm:$0xff] }
  0x31   :  { %v1270_v22 = vpack.c.bf16 %v168_v14, %v164_v13  ;;  %v172_v26 = vld [vmem:[%s2536_s1 + $0x498] sm:$0xff]  ;;  %v175_v35 = vld [vmem:[%s2536_s1 + $0x4b0] sm:$0xff]  ;;  %v178_v36 = vld [vmem:[%s2536_s1 + $0x4c8] sm:$0xff] }
  0x32   :  { %1105 = vmatpush1.bf16.msra.mxu0 %v1104_v19  ;;  %v161_v19 = vld [vmem:[%s2536_s1 + $0x440] sm:$0xff]  ;;  %v176_v27 = vld [vmem:[%s2536_s1 + $0x4b8] sm:$0xff]  ;;  %v183_v47 = vld [vmem:[%s2536_s1 + $0x4f0] sm:$0xff] }
  0x33   :  { %1249 = vmatpush1.bf16.msra.mxu1 %v1248_v20  ;;  %1107 = vmatprep.subr.bf16.mxu0 %v1106_v21  ;;  %v165_v20 = vld [vmem:[%s2536_s1 + $0x460] sm:$0xff]  ;;  %v163_v21 = vld [vmem:[%s2536_s1 + $0x450] sm:$0xff]  ;;  %v1274_v34 = vpack.c.bf16 %v176_v27, %v172_v26  ;;  %v180_v38 = vld [vmem:[%s2536_s1 + $0x4d8] sm:$0xff] }
  0x34   :  { %1251 = vmatprep.subr.bf16.mxu1 %v1250_v25  ;;  %v174_v25 = vld [vmem:[%s2536_s1 + $0x4a8] sm:$0xff]  ;;  %v1128_v28 = vpack.c.bf16 %v165_v20, %v161_v19  ;;  %v1272_v29 = vpack.c.bf16 %v167_v23, %v163_v21  ;;  %v184_v39 = vld [vmem:[%s2536_s1 + $0x4f8] sm:$0xff]  ;;  %v191_v59 = vld [vmem:[%s2536_s1 + $0x530] sm:$0xff] }
  0x35   :  { %v1130_v30 = vpack.c.bf16 %v174_v25, %v170_v24  ;;  %v1278_v46 = vpack.c.bf16 %v184_v39, %v180_v38  ;;  %v186_v48 = vld [vmem:[%s2536_s1 + $0x508] sm:$0xff]  ;;  %v188_v50 = vld [vmem:[%s2536_s1 + $0x518] sm:$0xff]  ;;  %v199_v7 = vld [vmem:[%s2536_s1 + $0x570] sm:$0xff] }
  0x36   :  { %1109 = vmatpush1.bf16.msra.mxu0 %v1108_v31  ;;  %v169_v31 = vld [vmem:[%s2536_s1 + $0x480] sm:$0xff]  ;;  %v192_v51 = vld [vmem:[%s2536_s1 + $0x538] sm:$0xff]  ;;  %v194_v60 = vld [vmem:[%s2536_s1 + $0x548] sm:$0xff] }
  0x37   :  { %1253 = vmatpush1.bf16.msra.mxu1 %v1252_v32  ;;  %1111 = vmatprep.subr.bf16.mxu0 %v1110_v33  ;;  %v173_v32 = vld [vmem:[%s2536_s1 + $0x4a0] sm:$0xff]  ;;  %v171_v33 = vld [vmem:[%s2536_s1 + $0x490] sm:$0xff]  ;;  %v1282_v58 = vpack.c.bf16 %v192_v51, %v188_v50  ;;  %v196_v62 = vld [vmem:[%s2536_s1 + $0x558] sm:$0xff] }
  0x38   :  { %1255 = vmatprep.subr.bf16.mxu1 %v1254_v37  ;;  %v182_v37 = vld [vmem:[%s2536_s1 + $0x4e8] sm:$0xff]  ;;  %v1132_v40 = vpack.c.bf16 %v173_v32, %v169_v31  ;;  %v1276_v41 = vpack.c.bf16 %v175_v35, %v171_v33  ;;  %v200_v63 = vld [vmem:[%s2536_s1 + $0x578] sm:$0xff]  ;;  %v201_v13 = vld [vmem:[%s2536_s1 + $0x580] sm:$0xff] }
  0x39   :  { %v1134_v42 = vpack.c.bf16 %v182_v37, %v178_v36  ;;  %v1286_v6 = vpack.c.bf16 %v200_v63, %v196_v62  ;;  %v202_v8 = vld [vmem:[%s2536_s1 + $0x588] sm:$0xff]  ;;  %v204_v10 = vld [vmem:[%s2536_s1 + $0x598] sm:$0xff]  ;;  %v215_v32 = vld [vmem:[%s2536_s1 + $0x5f0] sm:$0xff] }
  0x3a   :  { %1113 = vmatpush1.bf16.msra.mxu0 %v1112_v43  ;;  %v177_v43 = vld [vmem:[%s2536_s1 + $0x4c0] sm:$0xff]  ;;  %v208_v11 = vld [vmem:[%s2536_s1 + $0x5b8] sm:$0xff]  ;;  %v210_v20 = vld [vmem:[%s2536_s1 + $0x5c8] sm:$0xff] }
  0x3b   :  { %1257 = vmatpush1.bf16.msra.mxu1 %v1256_v44  ;;  %1115 = vmatprep.subr.bf16.mxu0 %v1114_v45  ;;  %v181_v44 = vld [vmem:[%s2536_s1 + $0x4e0] sm:$0xff]  ;;  %v179_v45 = vld [vmem:[%s2536_s1 + $0x4d0] sm:$0xff]  ;;  %v1290_v19 = vpack.c.bf16 %v208_v11, %v204_v10  ;;  %v214_v21 = vld [vmem:[%s2536_s1 + $0x5e8] sm:$0xff] }
  0x3c   :  { %1259 = vmatprep.subr.bf16.mxu1 %v1258_v49  ;;  %v190_v49 = vld [vmem:[%s2536_s1 + $0x528] sm:$0xff]  ;;  %v1136_v52 = vpack.c.bf16 %v181_v44, %v177_v43  ;;  %v1280_v53 = vpack.c.bf16 %v183_v47, %v179_v45  ;;  %v212_v23 = vld [vmem:[%s2536_s1 + $0x5d8] sm:$0xff]  ;;  %v1150_v27 = vpack.c.bf16 %v214_v21, %v210_v20  ;;  %v223_v44 = vld [vmem:[%s2536_s1 + $0x630] sm:$0xff] }
  0x3d   :  { %v1138_v54 = vpack.c.bf16 %v190_v49, %v186_v48  ;;  %v216_v24 = vld [vmem:[%s2536_s1 + $0x5f8] sm:$0xff]  ;;  %v218_v33 = vld [vmem:[%s2536_s1 + $0x608] sm:$0xff] }
  0x3e   :  { %1117 = vmatpush1.bf16.msra.mxu0 %v1116_v55  ;;  %v185_v55 = vld [vmem:[%s2536_s1 + $0x500] sm:$0xff]  ;;  %v1294_v31 = vpack.c.bf16 %v216_v24, %v212_v23  ;;  %v220_v35 = vld [vmem:[%s2536_s1 + $0x618] sm:$0xff]  ;;  %v226_v45 = vld [vmem:[%s2536_s1 + $0x648] sm:$0xff] }
  0x3f   :  { %1261 = vmatpush1.bf16.msra.mxu1 %v1260_v56  ;;  %1119 = vmatprep.subr.bf16.mxu0 %v1118_v57  ;;  %v189_v56 = vld [vmem:[%s2536_s1 + $0x520] sm:$0xff]  ;;  %v187_v57 = vld [vmem:[%s2536_s1 + $0x510] sm:$0xff]  ;;  %v224_v36 = vld [vmem:[%s2536_s1 + $0x638] sm:$0xff] }
  0x40   :  { %1263 = vmatprep.subr.bf16.mxu1 %v1262_v61  ;;  %v198_v61 = vld [vmem:[%s2536_s1 + $0x568] sm:$0xff]  ;;  %v1140_v0 = vpack.c.bf16 %v189_v56, %v185_v55  ;;  %v1284_v1 = vpack.c.bf16 %v191_v59, %v187_v57  ;;  %v1298_v43 = vpack.c.bf16 %v224_v36, %v220_v35  ;;  %v228_v47 = vld [vmem:[%s2536_s1 + $0x658] sm:$0xff]  ;;  %v231_v56 = vld [vmem:[%s2536_s1 + $0x670] sm:$0xff] }
  0x41   :  { %v1142_v2 = vpack.c.bf16 %v198_v61, %v194_v60  ;;  %v232_v48 = vld [vmem:[%s2536_s1 + $0x678] sm:$0xff]  ;;  %v234_v57 = vld [vmem:[%s2536_s1 + $0x688] sm:$0xff]  ;;  %v249_v24 = vld [vmem:[%s2536_s1 + $0x700] sm:$0xff] }
  0x42   :  { %1121 = vmatpush1.bf16.msra.mxu0 %v1120_v3  ;;  %v193_v3 = vld [vmem:[%s2536_s1 + $0x540] sm:$0xff]  ;;  %v1302_v55 = vpack.c.bf16 %v232_v48, %v228_v47  ;;  %v236_v59 = vld [vmem:[%s2536_s1 + $0x698] sm:$0xff] }
  0x43   :  { %1265 = vmatpush1.bf16.msra.mxu1 %v1264_v4  ;;  %1123 = vmatprep.subr.bf16.mxu0 %v1122_v5  ;;  %v197_v4 = vld [vmem:[%s2536_s1 + $0x560] sm:$0xff]  ;;  %v195_v5 = vld [vmem:[%s2536_s1 + $0x550] sm:$0xff]  ;;  %v240_v60 = vld [vmem:[%s2536_s1 + $0x6b8] sm:$0xff] }
  0x44   :  { %1267 = vmatprep.subr.bf16.mxu1 %v1266_v9  ;;  %v206_v9 = vld [vmem:[%s2536_s1 + $0x5a8] sm:$0xff]  ;;  %v1144_v12 = vpack.c.bf16 %v197_v4, %v193_v3  ;;  %v1288_v14 = vpack.c.bf16 %v199_v7, %v195_v5  ;;  %v1306_v3 = vpack.c.bf16 %v240_v60, %v236_v59  ;;  %v239_v4 = vld [vmem:[%s2536_s1 + $0x6b0] sm:$0xff]  ;;  %v244_v7 = vld [vmem:[%s2536_s1 + $0x6d8] sm:$0xff] }
  0x45   :  { %404 = vmatmul.mubr.f32.vlgmr.msra.gmra.mrb[0].mxu0 %v20_v15  ;;  %v242_v5 = vld [vmem:[%s2536_s1 + $0x6c8] sm:$0xff]  ;;  %v256_v20 = vld [vmem:[%s2536_s1 + $0x738] sm:$0xff]  ;;  %v257_v36 = vld [vmem:[%s2536_s1 + $0x740] sm:$0xff] }
  0x46   :  { %1125 = vmatpush1.bf16.msra.mxu0 %v1124_v16  ;;  %617 = vmatmul.mubr.f32.vlgmr.msra.gmra.mrb[0].mxu1 %v20_v15  ;;  %v1146_v15 = vpack.c.bf16 %v206_v9, %v202_v8  ;;  %v205_v16 = vld [vmem:[%s2536_s1 + $0x5a0] sm:$0xff]  ;;  %v248_v8 = vld [vmem:[%s2536_s1 + $0x6f8] sm:$0xff] }
  0x47   :  { %1269 = vmatpush1.bf16.msra.mxu1 %v1268_v17  ;;  %1127 = vmatprep.subr.bf16.mxu0 %v1126_v18  ;;  %v203_v17 = vld [vmem:[%s2536_s1 + $0x590] sm:$0xff]  ;;  %v1148_v25 = vpack.c.bf16 %v205_v16, %v201_v13  ;;  %v245_v13 = vld [vmem:[%s2536_s1 + $0x6e0] sm:$0xff] }
  0x48   :  { %1271 = vmatprep.subr.bf16.mxu1 %v1270_v22  ;;  %v207_v18 = vld [vmem:[%s2536_s1 + $0x5b0] sm:$0xff]  ;;  %v23_v22 = vld [vmem:[%s2537_s0 + $0x18] sm:$0xff]  ;;  %v265_v48 = vld [vmem:[%s2536_s1 + $0x780] sm:$0xff] }
  0x49   :  { %474 = vmatprep.mubr.f32.mxu0 %v23_v22  ;;  %687 = vmatprep.mubr.f32.mxu1 %v23_v22  ;;  %v1292_v26 = vpack.c.bf16 %v207_v18, %v203_v17  ;;  %v247_v16 = vld [vmem:[%s2536_s1 + $0x6f0] sm:$0xff]  ;;  %v250_v17 = vld [vmem:[%s2536_s1 + $0x708] sm:$0xff]  ;;  %v273_v60 = vld [vmem:[%s2536_s1 + $0x7c0] sm:$0xff] }
  0x4a   :  { %1129 = vmatpush1.bf16.msra.mxu0 %v1128_v28  ;;  %v209_v28 = vld [vmem:[%s2536_s1 + $0x5c0] sm:$0xff]  ;;  %v254_v18 = vld [vmem:[%s2536_s1 + $0x728] sm:$0xff] }
  0x4b   :  { %1273 = vmatpush1.bf16.msra.mxu1 %v1272_v29  ;;  %1131 = vmatprep.subr.bf16.mxu0 %v1130_v30  ;;  %v213_v29 = vld [vmem:[%s2536_s1 + $0x5e0] sm:$0xff]  ;;  %v211_v30 = vld [vmem:[%s2536_s1 + $0x5d0] sm:$0xff]  ;;  %v1170_v23 = vpack.c.bf16 %v254_v18, %v250_v17 }
  0x4c   :  { %1275 = vmatprep.subr.bf16.mxu1 %v1274_v34  ;;  %v222_v34 = vld [vmem:[%s2536_s1 + $0x628] sm:$0xff]  ;;  %v1152_v37 = vpack.c.bf16 %v213_v29, %v209_v28  ;;  %v1296_v38 = vpack.c.bf16 %v215_v32, %v211_v30  ;;  %v255_v28 = vld [vmem:[%s2536_s1 + $0x730] sm:$0xff]  ;;  %v264_v32 = vld [vmem:[%s2536_s1 + $0x778] sm:$0xff] }
  0x4d   :  { %v1154_v39 = vpack.c.bf16 %v222_v34, %v218_v33  ;;  %v258_v29 = vld [vmem:[%s2536_s1 + $0x748] sm:$0xff]  ;;  %v22_v17 = vld [vmem:[%s2537_s0 + $0x10] sm:$0xff] }
  0x4e   :  { %1133 = vmatpush1.bf16.msra.mxu0 %v1132_v40  ;;  %v217_v40 = vld [vmem:[%s2536_s1 + $0x600] sm:$0xff]  ;;  %v262_v30 = vld [vmem:[%s2536_s1 + $0x768] sm:$0xff] }
  0x4f   :  { %1277 = vmatpush1.bf16.msra.mxu1 %v1276_v41  ;;  %1135 = vmatprep.subr.bf16.mxu0 %v1134_v42  ;;  %v221_v41 = vld [vmem:[%s2536_s1 + $0x620] sm:$0xff]  ;;  %v219_v42 = vld [vmem:[%s2536_s1 + $0x610] sm:$0xff]  ;;  %v1174_v35 = vpack.c.bf16 %v262_v30, %v258_v29  ;;  %v304_v29 = vld [vmem:[%s2536_s1 + $0x8b8] sm:$0xff] }
  0x50   :  { %1279 = vmatprep.subr.bf16.mxu1 %v1278_v46  ;;  %v230_v46 = vld [vmem:[%s2536_s1 + $0x668] sm:$0xff]  ;;  %v1156_v49 = vpack.c.bf16 %v221_v41, %v217_v40  ;;  %v1300_v50 = vpack.c.bf16 %v223_v44, %v219_v42  ;;  %v263_v40 = vld [vmem:[%s2536_s1 + $0x770] sm:$0xff]  ;;  %v272_v44 = vld [vmem:[%s2536_s1 + $0x7b8] sm:$0xff] }
  0x51   :  { %v1158_v51 = vpack.c.bf16 %v230_v46, %v226_v45  ;;  %v266_v41 = vld [vmem:[%s2536_s1 + $0x788] sm:$0xff] }
  0x52   :  { %1137 = vmatpush1.bf16.msra.mxu0 %v1136_v52  ;;  %v225_v52 = vld [vmem:[%s2536_s1 + $0x640] sm:$0xff]  ;;  %v270_v42 = vld [vmem:[%s2536_s1 + $0x7a8] sm:$0xff] }
  0x53   :  { %1281 = vmatpush1.bf16.msra.mxu1 %v1280_v53  ;;  %1139 = vmatprep.subr.bf16.mxu0 %v1138_v54  ;;  %v229_v53 = vld [vmem:[%s2536_s1 + $0x660] sm:$0xff]  ;;  %v227_v54 = vld [vmem:[%s2536_s1 + $0x650] sm:$0xff]  ;;  %v1178_v47 = vpack.c.bf16 %v270_v42, %v266_v41  ;;  %v308_v41 = vld [vmem:[%s2536_s1 + $0x8d8] sm:$0xff] }
  0x54   :  { %1283 = vmatprep.subr.bf16.mxu1 %v1282_v58  ;;  %v238_v58 = vld [vmem:[%s2536_s1 + $0x6a8] sm:$0xff]  ;;  %v1160_v61 = vpack.c.bf16 %v229_v53, %v225_v52  ;;  %v1304_v62 = vpack.c.bf16 %v231_v56, %v227_v54  ;;  %v271_v52 = vld [vmem:[%s2536_s1 + $0x7b0] sm:$0xff]  ;;  %v280_v56 = vld [vmem:[%s2536_s1 + $0x7f8] sm:$0xff] }
  0x55   :  { %v1162_v63 = vpack.c.bf16 %v238_v58, %v234_v57  ;;  %v274_v53 = vld [vmem:[%s2536_s1 + $0x7c8] sm:$0xff]  ;;  %v312_v42 = vld [vmem:[%s2536_s1 + $0x8f8] sm:$0xff] }
  0x56   :  { %1141 = vmatpush1.bf16.msra.mxu0 %v1140_v0  ;;  %v233_v0 = vld [vmem:[%s2536_s1 + $0x680] sm:$0xff]  ;;  %v278_v54 = vld [vmem:[%s2536_s1 + $0x7e8] sm:$0xff] }
  0x57   :  { %1285 = vmatpush1.bf16.msra.mxu1 %v1284_v1  ;;  %1143 = vmatprep.subr.bf16.mxu0 %v1142_v2  ;;  %v237_v1 = vld [vmem:[%s2536_s1 + $0x6a0] sm:$0xff]  ;;  %v235_v2 = vld [vmem:[%s2536_s1 + $0x690] sm:$0xff]  ;;  %v1182_v59 = vpack.c.bf16 %v278_v54, %v274_v53  ;;  %v818_v54 = vld [vmem:[%s2538_s3 + $0x188] sm:$0xff] }
  0x58   :  { %1287 = vmatprep.subr.bf16.mxu1 %v1286_v6  ;;  %v246_v6 = vld [vmem:[%s2536_s1 + $0x6e8] sm:$0xff]  ;;  %v1164_v9 = vpack.c.bf16 %v237_v1, %v233_v0  ;;  %v1308_v10 = vpack.c.bf16 %v239_v4, %v235_v2  ;;  %v279_v0 = vld [vmem:[%s2536_s1 + $0x7f0] sm:$0xff]  ;;  %v288_v4 = vld [vmem:[%s2536_s1 + $0x838] sm:$0xff] }
  0x59   :  { %v1166_v11 = vpack.c.bf16 %v246_v6, %v242_v5  ;;  %v282_v1 = vld [vmem:[%s2536_s1 + $0x808] sm:$0xff]  ;;  %v817_v53 = vld [vmem:[%s2538_s3 + $0x180] sm:$0xff] }
  0x5a   :  { %1145 = vmatpush1.bf16.msra.mxu0 %v1144_v12  ;;  %v241_v12 = vld [vmem:[%s2536_s1 + $0x6c0] sm:$0xff]  ;;  %v286_v2 = vld [vmem:[%s2536_s1 + $0x828] sm:$0xff] }
  0x5b   :  { %1289 = vmatpush1.bf16.msra.mxu1 %v1288_v14  ;;  %1147 = vmatprep.subr.bf16.mxu0 %v1146_v15  ;;  %v243_v14 = vld [vmem:[%s2536_s1 + $0x6d0] sm:$0xff]  ;;  %v1310_v15 = vpack.c.bf16 %v248_v8, %v244_v7  ;;  %v1168_v21 = vpack.c.bf16 %v245_v13, %v241_v12  ;;  %v1186_v7 = vpack.c.bf16 %v286_v2, %v282_v1  ;;  %v281_v8 = vld [vmem:[%s2536_s1 + $0x800] sm:$0xff]  ;;  %v290_v13 = vld [vmem:[%s2536_s1 + $0x848] sm:$0xff] }
  0x5c   :  { %1291 = vmatprep.subr.bf16.mxu1 %v1290_v19  ;;  %v252_v19 = vld [vmem:[%s2536_s1 + $0x718] sm:$0xff]  ;;  %v1312_v22 = vpack.c.bf16 %v247_v16, %v243_v14  ;;  %v287_v12 = vld [vmem:[%s2536_s1 + $0x830] sm:$0xff]  ;;  %v294_v14 = vld [vmem:[%s2536_s1 + $0x868] sm:$0xff] }
  0x5d   :  { %v296_v16 = vld [vmem:[%s2536_s1 + $0x878] sm:$0xff]  ;;  %v819_v1 = vld [vmem:[%s2538_s3 + $0x190] sm:$0xff] }
  0x5e   :  { %1149 = vmatpush1.bf16.msra.mxu0 %v1148_v25  ;;  %v253_v25 = vld [vmem:[%s2536_s1 + $0x720] sm:$0xff]  ;;  %v820_v2 = vld [vmem:[%s2538_s3 + $0x198] sm:$0xff] }
  0x5f   :  { %1293 = vmatpush1.bf16.msra.mxu1 %v1292_v26  ;;  %1151 = vmatprep.subr.bf16.mxu0 %v1150_v27  ;;  %v251_v26 = vld [vmem:[%s2536_s1 + $0x710] sm:$0xff]  ;;  %v1314_v27 = vpack.c.bf16 %v256_v20, %v252_v19  ;;  %v1172_v33 = vpack.c.bf16 %v253_v25, %v249_v24  ;;  %v1190_v20 = vpack.c.bf16 %v294_v14, %v290_v13  ;;  %v790_v13 = vld [vmem:[%s2538_s3 + $0xa8] sm:$0xff]  ;;  %v821_v14 = vld [vmem:[%s2538_s3 + $0x1a0] sm:$0xff] }
  0x60   :  { %1295 = vmatprep.subr.bf16.mxu1 %v1294_v31  ;;  %v260_v31 = vld [vmem:[%s2536_s1 + $0x758] sm:$0xff]  ;;  %v1316_v34 = vpack.c.bf16 %v255_v28, %v251_v26  ;;  %v295_v25 = vld [vmem:[%s2536_s1 + $0x870] sm:$0xff]  ;;  %v298_v26 = vld [vmem:[%s2536_s1 + $0x888] sm:$0xff] }
  0x61   :  { %v300_v28 = vld [vmem:[%s2536_s1 + $0x898] sm:$0xff] }
  0x62   :  { %1153 = vmatpush1.bf16.msra.mxu0 %v1152_v37  ;;  %v261_v37 = vld [vmem:[%s2536_s1 + $0x760] sm:$0xff] }
  0x63   :  { %1297 = vmatpush1.bf16.msra.mxu1 %v1296_v38  ;;  %1155 = vmatprep.subr.bf16.mxu0 %v1154_v39  ;;  %v259_v38 = vld [vmem:[%s2536_s1 + $0x750] sm:$0xff]  ;;  %v1318_v39 = vpack.c.bf16 %v264_v32, %v260_v31  ;;  %v1176_v45 = vpack.c.bf16 %v261_v37, %v257_v36  ;;  %v1338_v36 = vpack.c.bf16 %v304_v29, %v300_v28 }
  0x64   :  { %1299 = vmatprep.subr.bf16.mxu1 %v1298_v43  ;;  %v268_v43 = vld [vmem:[%s2536_s1 + $0x798] sm:$0xff]  ;;  %v1320_v46 = vpack.c.bf16 %v263_v40, %v259_v38  ;;  %v303_v37 = vld [vmem:[%s2536_s1 + $0x8b0] sm:$0xff]  ;;  %v306_v38 = vld [vmem:[%s2536_s1 + $0x8c8] sm:$0xff]  ;;  %v1423_v40 = vmov 0.0  }
  0x66   :  { %1157 = vmatpush1.bf16.msra.mxu0 %v1156_v49  ;;  %v269_v49 = vld [vmem:[%s2536_s1 + $0x7a0] sm:$0xff] }
  0x67   :  { %1301 = vmatpush1.bf16.msra.mxu1 %v1300_v50  ;;  %1159 = vmatprep.subr.bf16.mxu0 %v1158_v51  ;;  %v267_v50 = vld [vmem:[%s2536_s1 + $0x790] sm:$0xff]  ;;  %v1322_v51 = vpack.c.bf16 %v272_v44, %v268_v43  ;;  %v1180_v57 = vpack.c.bf16 %v269_v49, %v265_v48  ;;  %v1342_v49 = vpack.c.bf16 %v312_v42, %v308_v41 }
  0x68   :  { %1303 = vmatprep.subr.bf16.mxu1 %v1302_v55  ;;  %v276_v55 = vld [vmem:[%s2536_s1 + $0x7d8] sm:$0xff]  ;;  %v1324_v58 = vpack.c.bf16 %v271_v52, %v267_v50  ;;  %v307_v48 = vld [vmem:[%s2536_s1 + $0x8d0] sm:$0xff]  ;;  %v786_v52 = vld [vmem:[%s2538_s3 + $0x88] sm:$0xff] }
  0x69   :  { %v311_v50 = vld [vmem:[%s2536_s1 + $0x8f0] sm:$0xff] }
  0x6a   :  { %1161 = vmatpush1.bf16.msra.mxu0 %v1160_v61  ;;  %v277_v61 = vld [vmem:[%s2536_s1 + $0x7e0] sm:$0xff] }
  0x6b   :  { %1305 = vmatpush1.bf16.msra.mxu1 %v1304_v62  ;;  %1163 = vmatprep.subr.bf16.mxu0 %v1162_v63  ;;  %v275_v62 = vld [vmem:[%s2536_s1 + $0x7d0] sm:$0xff]  ;;  %v1326_v63 = vpack.c.bf16 %v280_v56, %v276_v55  ;;  %v1184_v5 = vpack.c.bf16 %v277_v61, %v273_v60  ;;  %v1344_v56 = vpack.c.bf16 %v311_v50, %v307_v48  ;;  %v801_v60 = vld [vmem:[%s2538_s3 + $0x100] sm:$0xff] }
  0x6c   :  { %1307 = vmatprep.subr.bf16.mxu1 %v1306_v3  ;;  %v284_v3 = vld [vmem:[%s2536_s1 + $0x818] sm:$0xff]  ;;  %v1328_v6 = vpack.c.bf16 %v279_v0, %v275_v62  ;;  %v1378_v61 = vpack.c.bf16 %v818_v54, %v817_v53  ;;  %v802_v62 = vld [vmem:[%s2538_s3 + $0x108] sm:$0xff]  ;;  %v795_v48 = vld [vmem:[%s2538_s3 + $0xd0] sm:$0xff] }
  0x6d   :  { %v788_v0 = vld [vmem:[%s2538_s3 + $0x98] sm:$0xff]  ;;  %v827_v50 = vld [vmem:[%s2538_s3 + $0x1d0] sm:$0xff] }
  0x6e   :  { %1165 = vmatpush1.bf16.msra.mxu0 %v1164_v9  ;;  %v285_v9 = vld [vmem:[%s2536_s1 + $0x820] sm:$0xff] }
  0x6f   :  { %1309 = vmatpush1.bf16.msra.mxu1 %v1308_v10  ;;  %1167 = vmatprep.subr.bf16.mxu0 %v1166_v11  ;;  %v283_v10 = vld [vmem:[%s2536_s1 + $0x810] sm:$0xff]  ;;  %v1330_v11 = vpack.c.bf16 %v288_v4, %v284_v3  ;;  %v1188_v18 = vpack.c.bf16 %v285_v9, %v281_v8  ;;  %v24_v3 = vld [vmem:[%s2537_s0 + $0x20] sm:$0xff]  ;;  %v772_v8 = vld [vmem:[%s2538_s3 + $0x18] sm:$0xff] }
  0x70   :  { %1311 = vmatprep.subr.bf16.mxu1 %v1310_v15  ;;  %v292_v15 = vld [vmem:[%s2536_s1 + $0x858] sm:$0xff]  ;;  %v1332_v19 = vpack.c.bf16 %v287_v12, %v283_v10  ;;  %v803_v9 = vld [vmem:[%s2538_s3 + $0x110] sm:$0xff]  ;;  %v1382_v10 = vpack.c.bf16 %v820_v2, %v819_v1  ;;  %v789_v12 = vld [vmem:[%s2538_s3 + $0xa0] sm:$0xff] }
  0x71   :  { %v1334_v24 = vpack.c.bf16 %v296_v16, %v292_v15  ;;  %v822_v15 = vld [vmem:[%s2538_s3 + $0x1a8] sm:$0xff] }
  0x72   :  { %1169 = vmatpush1.bf16.msra.mxu0 %v1168_v21  ;;  %v289_v21 = vld [vmem:[%s2536_s1 + $0x840] sm:$0xff] }
  0x73   :  { %1313 = vmatpush1.bf16.msra.mxu1 %v1312_v22  ;;  %1171 = vmatprep.subr.bf16.mxu0 %v1170_v23  ;;  %v293_v22 = vld [vmem:[%s2536_s1 + $0x860] sm:$0xff]  ;;  %v291_v23 = vld [vmem:[%s2536_s1 + $0x850] sm:$0xff] }
  0x74   :  { %1315 = vmatprep.subr.bf16.mxu1 %v1314_v27  ;;  %v302_v27 = vld [vmem:[%s2536_s1 + $0x8a8] sm:$0xff]  ;;  %v1192_v30 = vpack.c.bf16 %v293_v22, %v289_v21  ;;  %v1336_v31 = vpack.c.bf16 %v295_v25, %v291_v23  ;;  %v805_v21 = vld [vmem:[%s2538_s3 + $0x120] sm:$0xff]  ;;  %v1386_v22 = vpack.c.bf16 %v822_v15, %v821_v14  ;;  %v792_v25 = vld [vmem:[%s2538_s3 + $0xb8] sm:$0xff] }
  0x75   :  { %v1194_v32 = vpack.c.bf16 %v302_v27, %v298_v26  ;;  %v806_v23 = vld [vmem:[%s2538_s3 + $0x128] sm:$0xff]  ;;  %v823_v26 = vld [vmem:[%s2538_s3 + $0x1b0] sm:$0xff]  ;;  %v824_v27 = vld [vmem:[%s2538_s3 + $0x1b8] sm:$0xff] }
  0x76   :  { %1173 = vmatpush1.bf16.msra.mxu0 %v1172_v33  ;;  %v297_v33 = vld [vmem:[%s2536_s1 + $0x880] sm:$0xff]  ;;  %v1388_v29 = vpack.c.bf16 %v806_v23, %v805_v21  ;;  %v832_v14 = vld [vmem:[%s2538_s3 + $0x1f8] sm:$0xff]  ;;  %v783_v15 = vld [vmem:[%s2538_s3 + $0x70] sm:$0xff] }
  0x77   :  { %1317 = vmatpush1.bf16.msra.mxu1 %v1316_v34  ;;  %1175 = vmatprep.subr.bf16.mxu0 %v1174_v35  ;;  %v301_v34 = vld [vmem:[%s2536_s1 + $0x8a0] sm:$0xff]  ;;  %v299_v35 = vld [vmem:[%s2536_s1 + $0x890] sm:$0xff] }
  0x78   :  { %1319 = vmatprep.subr.bf16.mxu1 %v1318_v39  ;;  %v310_v39 = vld [vmem:[%s2536_s1 + $0x8e8] sm:$0xff]  ;;  %v1196_v43 = vpack.c.bf16 %v301_v34, %v297_v33  ;;  %v1340_v44 = vpack.c.bf16 %v303_v37, %v299_v35  ;;  %v807_v33 = vld [vmem:[%s2538_s3 + $0x130] sm:$0xff]  ;;  %v1390_v34 = vpack.c.bf16 %v824_v27, %v823_v26  ;;  %v808_v35 = vld [vmem:[%s2538_s3 + $0x138] sm:$0xff] }
  0x79   :  { %v794_v37 = vld [vmem:[%s2538_s3 + $0xc8] sm:$0xff]  ;;  %v1392_v41 = vpack.c.bf16 %v808_v35, %v807_v33 }
  0x7a   :  { %1177 = vmatpush1.bf16.msra.mxu0 %v1176_v45  ;;  %v1198_v45 = vpack.c.bf16 %v310_v39, %v306_v38  ;;  %v825_v38 = vld [vmem:[%s2538_s3 + $0x1c0] sm:$0xff]  ;;  %v826_v39 = vld [vmem:[%s2538_s3 + $0x1c8] sm:$0xff] }
  0x7b   :  { %1321 = vmatpush1.bf16.msra.mxu1 %v1320_v46  ;;  %1179 = vmatprep.subr.bf16.mxu0 %v1178_v47  ;;  %v305_v46 = vld [vmem:[%s2536_s1 + $0x8c0] sm:$0xff] }
  0x7c   :  { %1323 = vmatprep.subr.bf16.mxu1 %v1322_v51  ;;  %v309_v47 = vld [vmem:[%s2536_s1 + $0x8e0] sm:$0xff] }
  0x7d   :  { %v785_v51 = vld [vmem:[%s2538_s3 + $0x80] sm:$0xff]  ;;  %v1200_v55 = vpack.c.bf16 %v309_v47, %v305_v46  ;;  %v1394_v46 = vpack.c.bf16 %v826_v39, %v825_v38  ;;  %v810_v47 = vld [vmem:[%s2538_s3 + $0x148] sm:$0xff] }
  0x7e   :  { %1181 = vmatpush1.bf16.msra.mxu0 %v1180_v57  ;;  %v1346_v57 = vpack.c.bf16 %v786_v52, %v785_v51  ;;  %v828_v51 = vld [vmem:[%s2538_s3 + $0x1d8] sm:$0xff] }
  0x7f   :  { %1325 = vmatpush1.bf16.msra.mxu1 %v1324_v58  ;;  %1183 = vmatprep.subr.bf16.mxu0 %v1182_v59  ;;  %v769_v58 = vld [vmem:[%s2538_s3] sm:$0xff]  ;;  %v770_v59 = vld [vmem:[%s2538_s3 + $0x8] sm:$0xff] }
  0x80   :  { %1327 = vmatprep.subr.bf16.mxu1 %v1326_v63  ;;  %v787_v63 = vld [vmem:[%s2538_s3 + $0x90] sm:$0xff]  ;;  %v1348_v4 = vpack.c.bf16 %v770_v59, %v769_v58  ;;  %v1398_v58 = vpack.c.bf16 %v828_v51, %v827_v50  ;;  %v812_v59 = vld [vmem:[%s2538_s3 + $0x158] sm:$0xff] }
  0x82   :  { %1185 = vmatpush1.bf16.msra.mxu0 %v1184_v5  ;;  %v1380_v5 = vpack.c.bf16 %v802_v62, %v801_v60  ;;  %v797_v60 = vld [vmem:[%s2538_s3 + $0xe0] sm:$0xff] }
  0x83   :  { %1329 = vmatpush1.bf16.msra.mxu1 %v1328_v6  ;;  %1187 = vmatprep.subr.bf16.mxu0 %v1186_v7  ;;  %v1350_v6 = vpack.c.bf16 %v788_v0, %v787_v63  ;;  %v771_v7 = vld [vmem:[%s2538_s3 + $0x10] sm:$0xff]  ;;  %v829_v62 = vld [vmem:[%s2538_s3 + $0x1e0] sm:$0xff]  ;;  %v830_v63 = vld [vmem:[%s2538_s3 + $0x1e8] sm:$0xff] }
  0x84   :  { %1331 = vmatprep.subr.bf16.mxu1 %v1330_v11  ;;  %v804_v11 = vld [vmem:[%s2538_s3 + $0x118] sm:$0xff]  ;;  %v1352_v16 = vpack.c.bf16 %v772_v8, %v771_v7  ;;  %v814_v8 = vld [vmem:[%s2538_s3 + $0x168] sm:$0xff] }
  0x85   :  { %475 = vmatmul.mubr.f32.vlgmr.msra.gmra.mrb[0].mxu0 %v22_v17 }
  0x86   :  { %1189 = vmatpush1.bf16.msra.mxu0 %v1188_v18  ;;  %688 = vmatmul.mubr.f32.vlgmr.msra.gmra.mrb[0].mxu1 %v22_v17  ;;  %v1384_v17 = vpack.c.bf16 %v804_v11, %v803_v9  ;;  %v1354_v18 = vpack.c.bf16 %v790_v13, %v789_v12  ;;  %v800_v11 = vld [vmem:[%s2538_s3 + $0xf8] sm:$0xff]  ;;  %v831_v12 = vld [vmem:[%s2538_s3 + $0x1f0] sm:$0xff] }
  0x87   :  { %1333 = vmatpush1.bf16.msra.mxu1 %v1332_v19  ;;  %1191 = vmatprep.subr.bf16.mxu0 %v1190_v20  ;;  %v773_v19 = vld [vmem:[%s2538_s3 + $0x20] sm:$0xff]  ;;  %v774_v20 = vld [vmem:[%s2538_s3 + $0x28] sm:$0xff] }
  0x88   :  { %1335 = vmatprep.subr.bf16.mxu1 %v1334_v24  ;;  %545 = vmatprep.mubr.f32.mxu0 %v1423_v40  ;;  %v791_v24 = vld [vmem:[%s2538_s3 + $0xb0] sm:$0xff]  ;;  %v1356_v28 = vpack.c.bf16 %v774_v20, %v773_v19  ;;  %v816_v20 = vld [vmem:[%s2538_s3 + $0x178] sm:$0xff] }
  0x89   :  { %758 = vmatprep.mubr.f32.mxu1 %v1423_v40  ;;  %v815_v19 = vld [vmem:[%s2538_s3 + $0x170] sm:$0xff] }
  0x8a   :  { %1193 = vmatpush1.bf16.msra.mxu0 %v1192_v30  ;;  %v1358_v30 = vpack.c.bf16 %v792_v25, %v791_v24  ;;  %v1408_v21 = vpack.c.bf16 %v816_v20, %v815_v19  ;;  %v313_v25 = vld [vmem:[%s2539_s2] sm:$0xf] }
  0x8b   :  { %1337 = vmatpush1.bf16.msra.mxu1 %v1336_v31  ;;  %1195 = vmatprep.subr.bf16.mxu0 %v1194_v32  ;;  %v775_v31 = vld [vmem:[%s2538_s3 + $0x30] sm:$0xff]  ;;  %v776_v32 = vld [vmem:[%s2538_s3 + $0x38] sm:$0xff] }
  0x8c   :  { %1339 = vmatprep.subr.bf16.mxu1 %v1338_v36  ;;  %v793_v36 = vld [vmem:[%s2538_s3 + $0xc0] sm:$0xff]  ;;  %v1360_v40 = vpack.c.bf16 %v776_v32, %v775_v31 }
  0x8d   :  { %v1362_v42 = vpack.c.bf16 %v794_v37, %v793_v36 }
  0x8e   :  { %1197 = vmatpush1.bf16.msra.mxu0 %v1196_v43  ;;  %v777_v43 = vld [vmem:[%s2538_s3 + $0x40] sm:$0xff] }
  0x8f   :  { %1341 = vmatpush1.bf16.msra.mxu1 %v1340_v44  ;;  %1199 = vmatprep.subr.bf16.mxu0 %v1198_v45  ;;  %v778_v44 = vld [vmem:[%s2538_s3 + $0x48] sm:$0xff]  ;;  %v809_v45 = vld [vmem:[%s2538_s3 + $0x140] sm:$0xff] }
  0x90   :  { %1343 = vmatprep.subr.bf16.mxu1 %v1342_v49  ;;  %v796_v49 = vld [vmem:[%s2538_s3 + $0xd8] sm:$0xff]  ;;  %v1364_v52 = vpack.c.bf16 %v778_v44, %v777_v43  ;;  %v1396_v53 = vpack.c.bf16 %v810_v47, %v809_v45  ;;  %v987_v47 = vld [vmem:[%s2540_s4] ss:$0 sm:$0xff] }
  0x91   :  { %v1366_v54 = vpack.c.bf16 %v796_v49, %v795_v48 }
  0x92   :  { %1201 = vmatpush1.bf16.msra.mxu0 %v1200_v55  ;;  %v779_v55 = vld [vmem:[%s2538_s3 + $0x50] sm:$0xff] }
  0x93   :  { %1345 = vmatpush1.bf16.msra.mxu1 %v1344_v56  ;;  %1347 = vmatprep.subr.bf16.mxu0 %v1346_v57  ;;  %v780_v56 = vld [vmem:[%s2538_s3 + $0x58] sm:$0xff]  ;;  %v811_v57 = vld [vmem:[%s2538_s3 + $0x150] sm:$0xff] }
  0x94   :  { %1379 = vmatprep.subr.bf16.mxu1 %v1378_v61  ;;  %v798_v61 = vld [vmem:[%s2538_s3 + $0xe8] sm:$0xff]  ;;  %v1368_v0 = vpack.c.bf16 %v780_v56, %v779_v55  ;;  %v1400_v1 = vpack.c.bf16 %v812_v59, %v811_v57 }
  0x95   :  { %985 = vmatmul.mubr.msk.f32.vlgmr.msra.gmra.mrb[0].mxu0 %vm335_vm0, %v24_v3  ;;  %v1370_v2 = vpack.c.bf16 %v798_v61, %v797_v60 }
  0x96   :  { %986 = vmatmul.mubr.msk.f32.vlgmr.msra.gmra.mrb[0].mxu1 %vm335_vm0, %v24_v3  ;;  %1349 = vmatpush3.bf16.msra.mxu0 %v1348_v4  ;;  %v1402_v3 = vpack.c.bf16 %v830_v63, %v829_v62  ;;  %v781_v4 = vld [vmem:[%s2538_s3 + $0x60] sm:$0xff] }
  0x97   :  { %1381 = vmatpush3.bf16.msra.mxu1 %v1380_v5  ;;  %1351 = vmatprep.subr.bf16.mxu0 %v1350_v6  ;;  %v782_v5 = vld [vmem:[%s2538_s3 + $0x68] sm:$0xff]  ;;  %v813_v6 = vld [vmem:[%s2538_s3 + $0x160] sm:$0xff] }
  0x98   :  { %1383 = vmatprep.subr.bf16.mxu1 %v1382_v10  ;;  %v1372_v7 = vpack.c.bf16 %v782_v5, %v781_v4  ;;  %v1404_v9 = vpack.c.bf16 %v814_v8, %v813_v6  ;;  %v799_v10 = vld [vmem:[%s2538_s3 + $0xf0] sm:$0xff] }
  0x99   :  { %v1374_v13 = vpack.c.bf16 %v800_v11, %v799_v10 }
  0x9a   :  { %1353 = vmatpush3.bf16.msra.mxu0 %v1352_v16  ;;  %v784_v16 = vld [vmem:[%s2538_s3 + $0x78] sm:$0xff] }
  0x9b   :  { %1385 = vmatpush3.bf16.msra.mxu1 %v1384_v17  ;;  %1355 = vmatprep.subr.bf16.mxu0 %v1354_v18  ;;  %v1406_v17 = vpack.c.bf16 %v832_v14, %v831_v12  ;;  %v1376_v18 = vpack.c.bf16 %v784_v16, %v783_v15 }
  0x9c   :  { %1387 = vmatprep.subr.bf16.mxu1 %v1386_v22  ;;  %v315_v22 = vlaneseq }
  0x9e   :  { %1357 = vmatpush3.bf16.msra.mxu0 %v1356_v28  ;;  %v316_v23 = vshrl.u32 %v315_v22, 7 }
  0x9f   :  { %1389 = vmatpush3.bf16.msra.mxu1 %v1388_v29  ;;  %1359 = vmatprep.subr.bf16.mxu0 %v1358_v30 }
  0xa0   :  { %1391 = vmatprep.subr.bf16.mxu1 %v1390_v34  ;;  %v317_v24 = vsub.s32 0, %v316_v23  ;;  %v325_v26 = vsub.s32 2, %v316_v23  ;;  %v321_v27 = vsub.s32 1, %v316_v23  ;;  %v329_v28 = vsub.s32 3, %v316_v23 }
  0xa2   :  { %1361 = vmatpush3.bf16.msra.mxu0 %v1360_v40  ;;  %v318_v29 = vrot.slane %v313_v25, %v317_v24  ;;  %v326_v30 = vrot.slane %v313_v25, %v325_v26  ;;  %v322_v31 = vrot.slane %v313_v25, %v321_v27  ;;  %v330_v32 = vrot.slane %v313_v25, %v329_v28 }
  0xa3   :  { %1393 = vmatpush3.bf16.msra.mxu1 %v1392_v41  ;;  %1363 = vmatprep.subr.bf16.mxu0 %v1362_v42 }
  0xa4   :  { %1395 = vmatprep.subr.bf16.mxu1 %v1394_v46 }
  0xa6   :  { %1365 = vmatpush3.bf16.msra.mxu0 %v1364_v52 }
  0xa7   :  { %1397 = vmatpush3.bf16.msra.mxu1 %v1396_v53  ;;  %1367 = vmatprep.subr.bf16.mxu0 %v1366_v54 }
  0xa8   :  { %1399 = vmatprep.subr.bf16.mxu1 %v1398_v58 }
  0xaa   :  { %1369 = vmatpush3.bf16.msra.mxu0 %v1368_v0 }
  0xab   :  { %1401 = vmatpush3.bf16.msra.mxu1 %v1400_v1  ;;  %1371 = vmatprep.subr.bf16.mxu0 %v1370_v2 }
  0xac   :  { %1403 = vmatprep.subr.bf16.mxu1 %v1402_v3 }
  0xae   :  { %1373 = vmatpush3.bf16.msra.mxu0 %v1372_v7 }
  0xaf   :  { %1405 = vmatpush3.bf16.msra.mxu1 %v1404_v9  ;;  %1375 = vmatprep.subr.bf16.mxu0 %v1374_v13 }
  0xb0   :  { %1407 = vmatprep.subr.bf16.mxu1 %v1406_v17 }
  0xb2   :  { %1377 = vmatpush3.bf16.msra.mxu0 %v1376_v18 }
  0xb3   :  { %1409 = vmatpush3.bf16.msra.mxu1 %v1408_v21 }
 0x168   :  { %v547_v33 = vpop.f32.mrb[0].mxu0 }
 0x169   :  { %v1410_v34 = vadd.f32 %v547_v33, %v318_v29  ;;  %v760_v35 = vpop.f32.mrb[0].mxu1  ;;  %v549_v36 = vpop.f32.mrb[1].mxu0 }
 0x16a   :  { %v1412_v37 = vadd.f32 %v760_v35, %v326_v30  ;;  %v1411_v38 = vadd.f32 %v549_v36, %v322_v31  ;;  %v762_v39 = vpop.f32.mrb[1].mxu1 }
 0x16b   :  { %v1413_v40 = vadd.f32 %v762_v39, %v330_v32  ;;  %v765_v42 = vmax.f32 %v1410_v34, 0.0 }
 0x16c   :  { %v766_v41 = vmax.f32 %v1411_v38, 0.0  ;;  %v767_v44 = vmax.f32 %v1412_v37, 0.0 }
 0x16d   :  { %v768_v43 = vmax.f32 %v1413_v40, 0.0 }
 0x16e   :  { %904 = vmatprep.mubr.f32.mxu0 %v766_v41 }
 0x16f   :  { %974 = vmatprep.mubr.f32.mxu1 %v768_v43  ;;  %905 = vmatmul.mubr.f32.vlgmr.msra.gmra.mrb[2].mxu0 %v765_v42 }
 0x170   :  { %975 = vmatmul.mubr.f32.vlgmr.msra.gmra.mrb[2].mxu1 %v767_v44 }
 0x242   :  { %v1020_v45 = vpop.f32.mrb[2].mxu0 }
 0x243   :  { %v1055_v46 = vpop.f32.mrb[2].mxu1  ;;  %v1021_v48 = vpop.f32.mrb[3].mxu0 }
 0x244   :  { %v1022_v49 = vadd.f32 %v1021_v48, %v1020_v45  ;;  %v1056_v50 = vpop.f32.mrb[3].mxu1 }
 0x245   :  { %v1057_v51 = vadd.f32 %v1056_v50, %v1055_v46 }
 0x246   :  { %v907_v52 = vadd.f32 %v1022_v49, %v987_v47 }
 0x248   :  { %v977_v53 = vadd.f32 %v1057_v51, %v907_v52 }
 0x24a   :  { %980 = vst [vmem:[%s2541_s5] sm:$0xff] %v977_v53 }

</bundles_post_ra>
